<compile_context>
chip_gen: v6e
topology: v6e:2x2x1
jax: 0.10.0
libtpu: 0.0.40
codegen_flags: <defaults>
</compile_context>

<pallas_src>
import math

import jax
import jax.numpy as jnp
from jax.experimental import pallas as pl
from jax.experimental.pallas import tpu as pltpu

EPS = 1e-6
MXU_DTYPE = jnp.bfloat16        # matmul operand dtype (f32 accumulation on the MXU)
LANE = 128                      # TPU lane width  (last dim / channels)
SUBLANE = 8                     # f32 sublane width (second-to-last dim / rows)


def _round_up(a, b):
    return (a + b - 1) // b * b


def _round_down(a, b):
    return a // b * b


def _vmem_budget_bytes():
    """Per-generation VMEM budget: ~75% of physical, clamped to [32 MiB, 100 MiB]."""
    cap = 64 << 20  # conservative fallback (v7x per-TensorCore VMEM)
    try:
        cap = int(getattr(pltpu.get_tpu_info(), "vmem_capacity_bytes", cap))
    except Exception:
        pass
    return int(min(max(32 << 20, cap * 3 // 4), 100 << 20))


def _select_tile_rows(M, C, io_itemsize, vmem_budget, weight_buffers,
                      tm_max=1024, min_grid_steps=4):
    """Largest row tile that fits the VMEM budget and keeps >= min_grid_steps steps."""
    if M <= SUBLANE:
        return max(1, M)  # single full-extent block
    # Resident weights: bf16 ada(C,3C) + w1(C,C) + w2(C,C) = 5*C^2 elems, plus f32
    # biases / LN params (negligible).
    weight_bytes = weight_buffers * (5 * C * C * 2) + (9 * C) * 4 * 2
    # Per-row VMEM: x / y / out tiles double-buffered at the I/O dtype, plus a
    # generous allowance for the f32 kernel intermediates (x32, y32, ada(3C), h, ...).
    per_row = 3 * 2 * C * io_itemsize + 12 * C * 4
    avail = vmem_budget - weight_bytes - (2 << 20)            # fixed headroom
    tm = max(SUBLANE, min(tm_max, avail // per_row))
    # Keep >= min_grid_steps grid steps so the "parallel" axis can shard across
    # both v7x TensorCores (near-free on single-TC v5e/v6e).
    tm = min(tm, max(SUBLANE, (M + min_grid_steps - 1) // min_grid_steps))
    return int(max(SUBLANE, _round_down(tm, SUBLANE)))


def resblock_kernel(x_ref, y_ref,
                    nln_w_ref, nln_b_ref,
                    ada_w_ref, ada_b_ref,
                    w1_ref, b1_ref,
                    w2_ref, b2_ref,
                    o_ref):
    C = x_ref.shape[-1]
    inv_c = 1.0 / C

    # LayerNorm statistics / residual in f32; matmul operands in bf16 (MXU rate).
    x32 = x_ref[...].astype(jnp.float32)
    y32 = y_ref[...].astype(jnp.float32)

    def layernorm(v):
        # Single-pass statistics: both reductions issued without a serializing
        # dependency (var = E[v^2] - mean^2).
        mu = jnp.sum(v, axis=-1, keepdims=True) * inv_c
        ex2 = jnp.sum(v * v, axis=-1, keepdims=True) * inv_c
        var = ex2 - mu * mu
        return (v - mu) * jax.lax.rsqrt(var + EPS)

    # ---- noise_ln: LayerNorm(affine, eps=1e-6) on y ----
    y_ln = layernorm(y32) * nln_w_ref[...] + nln_b_ref[...]

    # ---- adaLN_modulation: SiLU -> Linear(C, 3C), f32 accumulation on the MXU ----
    y_act = (y_ln * jax.nn.sigmoid(y_ln)).astype(MXU_DTYPE)
    ada = jnp.dot(y_act, ada_w_ref[...],
                  preferred_element_type=jnp.float32) + ada_b_ref[...]
    # C is a multiple of 128, so these slices are lane-tile-aligned free views.
    shift = ada[:, 0 * C:1 * C]
    scale = ada[:, 1 * C:2 * C]
    gate = ada[:, 2 * C:3 * C]

    # ---- in_ln (no affine, eps=1e-6) on x + modulate ----
    h = (layernorm(x32) * (1.0 + scale) + shift).astype(MXU_DTYPE)

    # ---- MLP: Linear -> SiLU -> Linear (bf16 operands, f32 accumulation) ----
    h = jnp.dot(h, w1_ref[...], preferred_element_type=jnp.float32) + b1_ref[...]
    h = (h * jax.nn.sigmoid(h)).astype(MXU_DTYPE)
    h = jnp.dot(h, w2_ref[...], preferred_element_type=jnp.float32) + b2_ref[...]

    # ---- gated residual (f32, then cast to the HBM/output dtype) ----
    o_ref[...] = (x32 + gate * h).astype(o_ref.dtype)


def prepare_params(params):
    """Hoist per-call weight conversions out of the hot path (run once per layer)."""
    C = params["mlp_w1"].shape[0]
    return {
        "nln_w": params["noise_ln_w"].astype(jnp.float32).reshape(1, C),
        "nln_b": params["noise_ln_b"].astype(jnp.float32).reshape(1, C),
        "ada_w": params["ada_w"].astype(MXU_DTYPE),               # (C, 3C)
        "ada_b": params["ada_b"].astype(jnp.float32).reshape(1, 3 * C),
        "w1": params["mlp_w1"].astype(MXU_DTYPE),                 # (C, C)
        "b1": params["mlp_b1"].astype(jnp.float32).reshape(1, C),
        "w2": params["mlp_w2"].astype(MXU_DTYPE),                 # (C, C)
        "b2": params["mlp_b2"].astype(jnp.float32).reshape(1, C),
    }


def resblock_forward(x, y, prepared, *, tm=None, single_buffer_weights=None):
    """x, y: (..., C) with matching shapes.  Returns same shape & dtype as x.

    Pass bf16 x/y to halve HBM traffic (the kernel is memory-bound); all internal
    LayerNorm / bias / gate / residual math stays f32.
    """
    orig_shape = x.shape
    C = x.shape[-1]
    if C % LANE != 0:
        raise ValueError(f"channels ({C}) must be a multiple of {LANE} for the "
                         "lane-aligned shift/scale/gate slices and (8,128) tiling")
    M = math.prod(x.shape[:-1]) if x.ndim > 1 else 1
    x2 = x.reshape(M, C)
    y2 = y.reshape(M, C)

    # Only drop the second weight buffer when it actually buys row-tile budget
    # (resident bf16 weights >= 4 MiB, i.e. large C).  At C=128 it is ~0.16 MiB.
    if single_buffer_weights is None:
        single_buffer_weights = (5 * C * C * 2) >= (4 << 20)
    weight_buffers = 1 if single_buffer_weights else 2

    vmem_budget = _vmem_budget_bytes()
    io_itemsize = jnp.dtype(x2.dtype).itemsize
    if tm is None:
        tm = _select_tile_rows(M, C, io_itemsize, vmem_budget, weight_buffers)
    else:
        tm = max(SUBLANE, min(_round_down(int(tm), SUBLANE), _round_up(M, SUBLANE)))
        if M <= SUBLANE:
            tm = M

    grid = (pl.cdiv(M, tm),)  # no host-side padding; last block may be partial

    row_spec = pl.BlockSpec((tm, C), lambda i: (i, 0))
    # If a profile shows exposed DMA, switch row_spec to pipeline_mode=pl.Buffered(3).

    def const_spec(shape):
        # Constant index_map across the grid -> the block is not re-DMA'd per step.
        idx_map = lambda i: (0, 0)
        if single_buffer_weights:
            try:
                return pl.BlockSpec(shape, idx_map, pipeline_mode=pl.Buffered(1))
            except (TypeError, AttributeError):
                pass  # older JAX without pipeline_mode: fall back to default depth
        return pl.BlockSpec(shape, idx_map)

    out = pl.pallas_call(
        resblock_kernel,
        out_shape=jax.ShapeDtypeStruct((M, C), x.dtype),
        grid_spec=pltpu.PrefetchScalarGridSpec(
            num_scalar_prefetch=0,
            grid=grid,
            in_specs=[
                row_spec,                        # x rows
                row_spec,                        # y rows
                const_spec((1, C)),              # noise_ln weight
                const_spec((1, C)),              # noise_ln bias
                const_spec((C, 3 * C)),          # adaLN linear weight (bf16)
                const_spec((1, 3 * C)),          # adaLN linear bias
                const_spec((C, C)),              # mlp linear 1 weight (bf16)
                const_spec((1, C)),              # mlp linear 1 bias
                const_spec((C, C)),              # mlp linear 2 weight (bf16)
                const_spec((1, C)),              # mlp linear 2 bias
            ],
            out_specs=row_spec,
        ),
        compiler_params=pltpu.CompilerParams(
            dimension_semantics=("parallel",),
            vmem_limit_bytes=vmem_budget,
        ),
    )(x2, y2,
      prepared["nln_w"], prepared["nln_b"],
      prepared["ada_w"], prepared["ada_b"],
      prepared["w1"], prepared["b1"],
      prepared["w2"], prepared["b2"])

    return out.reshape(orig_shape)


def _reference_forward(x, y, p):
    """Plain-JAX reference mirroring the kernel's mixed-precision MXU path."""
    def ln(v):
        v = v.astype(jnp.float32)
        mu = jnp.mean(v, -1, keepdims=True)
        var = jnp.mean((v - mu) ** 2, -1, keepdims=True)
        return (v - mu) * jax.lax.rsqrt(var + EPS)

    y_ln = ln(y) * p["noise_ln_w"] + p["noise_ln_b"]
    y_act = (y_ln * jax.nn.sigmoid(y_ln)).astype(MXU_DTYPE)
    ada = jnp.dot(y_act, p["ada_w"].astype(MXU_DTYPE),
                  preferred_element_type=jnp.float32) + p["ada_b"]
    shift, scale, gate = jnp.split(ada, 3, axis=-1)
    h = (ln(x) * (1.0 + scale) + shift).astype(MXU_DTYPE)
    h = jnp.dot(h, p["mlp_w1"].astype(MXU_DTYPE),
                preferred_element_type=jnp.float32) + p["mlp_b1"]
    h = (h * jax.nn.sigmoid(h)).astype(MXU_DTYPE)
    h = jnp.dot(h, p["mlp_w2"].astype(MXU_DTYPE),
                preferred_element_type=jnp.float32) + p["mlp_b2"]
    return (x.astype(jnp.float32) + gate * h).astype(x.dtype)


def make_params(key, channels):
    C = channels
    ks = jax.random.split(key, 6)
    s = 1.0 / jnp.sqrt(C)
    return {
        "noise_ln_w": jnp.ones((C,), jnp.float32),
        "noise_ln_b": jnp.zeros((C,), jnp.float32),
        "ada_w": jax.random.uniform(ks[0], (C, 3 * C), jnp.float32, -s, s),
        "ada_b": jax.random.uniform(ks[1], (3 * C,), jnp.float32, -s, s),
        "mlp_w1": jax.random.uniform(ks[2], (C, C), jnp.float32, -s, s),
        "mlp_b1": jax.random.uniform(ks[3], (C,), jnp.float32, -s, s),
        "mlp_w2": jax.random.uniform(ks[4], (C, C), jnp.float32, -s, s),
        "mlp_b2": jax.random.uniform(ks[5], (C,), jnp.float32, -s, s),
    }


if __name__ == "__main__":
    # ScoreLossZ's ResBlock sees 2-D (batch, width) activations.  Keep it small but
    # lane-aligned (C multiple of 128).  B=250 is deliberately NOT a multiple of the
    # auto-chosen row tile, exercising the no-pad / partial-last-block path.
    C = 128
    key = jax.random.PRNGKey(0)
    kx, ky, kp = jax.random.split(key, 3)
    params = make_params(kp, C)
    prepared = prepare_params(params)   # weight casts hoisted out of the hot path

    # --- f32 I/O run (ragged M -> cdiv grid, masked partial block) ---
    B = 250
    x = jax.random.normal(kx, (B, C), jnp.float32)
    y = jax.random.normal(ky, (B, C), jnp.float32)
    out = jax.block_until_ready(resblock_forward(x, y, prepared))
    ref = _reference_forward(x, y, params)
    assert out.shape == x.shape and out.dtype == x.dtype
    err = float(jnp.max(jnp.abs(out - ref)))
    assert jnp.allclose(out, ref, atol=2e-3, rtol=2e-3), f"f32 mismatch: {err}"

    # --- bf16 HBM-boundary run (halves kernel I/O bytes; internals stay f32) ---
    B2 = 256
    xb = jax.random.normal(kx, (B2, C), jnp.float32).astype(jnp.bfloat16)
    yb = jax.random.normal(ky, (B2, C), jnp.float32).astype(jnp.bfloat16)
    out_b = jax.block_until_ready(resblock_forward(xb, yb, prepared))
    ref_b = _reference_forward(xb, yb, params)
    assert out_b.shape == xb.shape and out_b.dtype == jnp.bfloat16
    err_b = float(jnp.max(jnp.abs(out_b.astype(jnp.float32) - ref_b.astype(jnp.float32))))
    assert err_b < 6e-2, f"bf16 mismatch: {err_b}"

    print("KERNEL_OK")
</pallas_src>

<mosaic_0001>
module attributes {stable_mosaic.version = 11 : i64} {
  func.func @resblock_kernel(%arg0: i32, %arg1: memref<56x128xf32, #tpu.memory_space<vmem>>, %arg2: memref<56x128xf32, #tpu.memory_space<vmem>>, %arg3: memref<1x128xf32, #tpu.memory_space<vmem>>, %arg4: memref<1x128xf32, #tpu.memory_space<vmem>>, %arg5: memref<128x384xbf16, #tpu.memory_space<vmem>>, %arg6: memref<1x384xf32, #tpu.memory_space<vmem>>, %arg7: memref<128x128xbf16, #tpu.memory_space<vmem>>, %arg8: memref<1x128xf32, #tpu.memory_space<vmem>>, %arg9: memref<128x128xbf16, #tpu.memory_space<vmem>>, %arg10: memref<1x128xf32, #tpu.memory_space<vmem>>, %arg11: memref<56x128xf32, #tpu.memory_space<vmem>>) attributes {dimension_semantics = [#tpu.dimension_semantics<parallel>], iteration_bounds = array<i64: 5>, scalar_prefetch = 0 : i64, scratch_operands = 0 : i64, tpu.core_type = #tpu.core_type<tc>, window_params = [{transform_indices = @transform_0, window_bounds = array<i64: 56, 128>}, {transform_indices = @transform_1, window_bounds = array<i64: 56, 128>}, {pipeline_mode = #tpu.pipeline_mode<synchronous>, transform_indices = @transform_2, window_bounds = array<i64: 1, 128>}, {pipeline_mode = #tpu.pipeline_mode<synchronous>, transform_indices = @transform_3, window_bounds = array<i64: 1, 128>}, {pipeline_mode = #tpu.pipeline_mode<synchronous>, transform_indices = @transform_4, window_bounds = array<i64: 128, 384>}, {pipeline_mode = #tpu.pipeline_mode<synchronous>, transform_indices = @transform_5, window_bounds = array<i64: 1, 384>}, {pipeline_mode = #tpu.pipeline_mode<synchronous>, transform_indices = @transform_6, window_bounds = array<i64: 128, 128>}, {pipeline_mode = #tpu.pipeline_mode<synchronous>, transform_indices = @transform_7, window_bounds = array<i64: 1, 128>}, {pipeline_mode = #tpu.pipeline_mode<synchronous>, transform_indices = @transform_8, window_bounds = array<i64: 128, 128>}, {pipeline_mode = #tpu.pipeline_mode<synchronous>, transform_indices = @transform_9, window_bounds = array<i64: 1, 128>}, {transform_indices = @transform_10, window_bounds = array<i64: 56, 128>}]} {
    %c0 = arith.constant 0 : index
    %c0_0 = arith.constant 0 : index
    %0 = vector.load %arg1[%c0, %c0_0] : memref<56x128xf32, #tpu.memory_space<vmem>>, vector<56x128xf32>
    %c0_1 = arith.constant 0 : index
    %c0_2 = arith.constant 0 : index
    %1 = vector.load %arg2[%c0_1, %c0_2] : memref<56x128xf32, #tpu.memory_space<vmem>>, vector<56x128xf32>
    %cst = arith.constant dense<0.000000e+00> : vector<56xf32>
    %2 = vector.multi_reduction <add>, %1, %cst [1] : vector<56x128xf32> to vector<56xf32>
    %3 = vector.shape_cast %2 : vector<56xf32> to vector<56x1xf32>
    %cst_3 = arith.constant 7.812500e-03 : f32
    %4 = vector.broadcast %cst_3 : f32 to vector<56x1xf32>
    %5 = arith.mulf %3, %4 : vector<56x1xf32>
    %6 = arith.mulf %1, %1 : vector<56x128xf32>
    %cst_4 = arith.constant dense<0.000000e+00> : vector<56xf32>
    %7 = vector.multi_reduction <add>, %6, %cst_4 [1] : vector<56x128xf32> to vector<56xf32>
    %8 = vector.shape_cast %7 : vector<56xf32> to vector<56x1xf32>
    %cst_5 = arith.constant 7.812500e-03 : f32
    %9 = vector.broadcast %cst_5 : f32 to vector<56x1xf32>
    %10 = arith.mulf %8, %9 : vector<56x1xf32>
    %11 = arith.mulf %5, %5 : vector<56x1xf32>
    %12 = arith.subf %10, %11 : vector<56x1xf32>
    %13 = vector.broadcast %5 : vector<56x1xf32> to vector<56x128xf32>
    %14 = arith.subf %1, %13 : vector<56x128xf32>
    %cst_6 = arith.constant 9.99999997E-7 : f32
    %15 = vector.broadcast %cst_6 : f32 to vector<56x1xf32>
    %16 = arith.addf %12, %15 : vector<56x1xf32>
    %17 = math.rsqrt %16 : vector<56x1xf32>
    %18 = vector.broadcast %17 : vector<56x1xf32> to vector<56x128xf32>
    %19 = arith.mulf %14, %18 : vector<56x128xf32>
    %c0_7 = arith.constant 0 : index
    %c0_8 = arith.constant 0 : index
    %20 = vector.load %arg3[%c0_7, %c0_8] : memref<1x128xf32, #tpu.memory_space<vmem>>, vector<1x128xf32>
    %21 = vector.broadcast %20 : vector<1x128xf32> to vector<56x128xf32>
    %22 = arith.mulf %19, %21 : vector<56x128xf32>
    %c0_9 = arith.constant 0 : index
    %c0_10 = arith.constant 0 : index
    %23 = vector.load %arg4[%c0_9, %c0_10] : memref<1x128xf32, #tpu.memory_space<vmem>>, vector<1x128xf32>
    %24 = vector.broadcast %23 : vector<1x128xf32> to vector<56x128xf32>
    %25 = arith.addf %22, %24 : vector<56x128xf32>
    %26 = arith.negf %25 : vector<56x128xf32>
    %27 = math.exp %26 : vector<56x128xf32>
    %cst_11 = arith.constant 1.000000e+00 : f32
    %28 = vector.broadcast %cst_11 : f32 to vector<56x128xf32>
    %29 = arith.addf %28, %27 : vector<56x128xf32>
    %30 = arith.divf %28, %29 : vector<56x128xf32>
    %31 = arith.mulf %25, %30 : vector<56x128xf32>
    %32 = arith.truncf %31 : vector<56x128xf32> to vector<56x128xbf16>
    %c0_12 = arith.constant 0 : index
    %c0_13 = arith.constant 0 : index
    %33 = vector.load %arg5[%c0_12, %c0_13] : memref<128x384xbf16, #tpu.memory_space<vmem>>, vector<128x384xbf16>
    %cst_14 = arith.constant dense<0.000000e+00> : vector<56x384xf32>
    %34 = tpu.matmul %32, %33, %cst_14 {dimension_numbers = #tpu.dot_dimension_numbers<[1], [0], [0], [1], [0, 0, 1, 1], [], []>} : vector<56x128xbf16>, vector<128x384xbf16>, vector<56x384xf32> -> vector<56x384xf32>
    %c0_15 = arith.constant 0 : index
    %c0_16 = arith.constant 0 : index
    %35 = vector.load %arg6[%c0_15, %c0_16] : memref<1x384xf32, #tpu.memory_space<vmem>>, vector<1x384xf32>
    %36 = vector.broadcast %35 : vector<1x384xf32> to vector<56x384xf32>
    %37 = arith.addf %34, %36 : vector<56x384xf32>
    %38 = vector.extract_strided_slice %37 {offsets = [0, 0], sizes = [56, 128], strides = [1, 1]} : vector<56x384xf32> to vector<56x128xf32>
    %39 = vector.extract_strided_slice %37 {offsets = [0, 128], sizes = [56, 128], strides = [1, 1]} : vector<56x384xf32> to vector<56x128xf32>
    %40 = vector.extract_strided_slice %37 {offsets = [0, 256], sizes = [56, 128], strides = [1, 1]} : vector<56x384xf32> to vector<56x128xf32>
    %cst_17 = arith.constant dense<0.000000e+00> : vector<56xf32>
    %41 = vector.multi_reduction <add>, %0, %cst_17 [1] : vector<56x128xf32> to vector<56xf32>
    %42 = vector.shape_cast %41 : vector<56xf32> to vector<56x1xf32>
    %cst_18 = arith.constant 7.812500e-03 : f32
    %43 = vector.broadcast %cst_18 : f32 to vector<56x1xf32>
    %44 = arith.mulf %42, %43 : vector<56x1xf32>
    %45 = arith.mulf %0, %0 : vector<56x128xf32>
    %cst_19 = arith.constant dense<0.000000e+00> : vector<56xf32>
    %46 = vector.multi_reduction <add>, %45, %cst_19 [1] : vector<56x128xf32> to vector<56xf32>
    %47 = vector.shape_cast %46 : vector<56xf32> to vector<56x1xf32>
    %cst_20 = arith.constant 7.812500e-03 : f32
    %48 = vector.broadcast %cst_20 : f32 to vector<56x1xf32>
    %49 = arith.mulf %47, %48 : vector<56x1xf32>
    %50 = arith.mulf %44, %44 : vector<56x1xf32>
    %51 = arith.subf %49, %50 : vector<56x1xf32>
    %52 = vector.broadcast %44 : vector<56x1xf32> to vector<56x128xf32>
    %53 = arith.subf %0, %52 : vector<56x128xf32>
    %cst_21 = arith.constant 9.99999997E-7 : f32
    %54 = vector.broadcast %cst_21 : f32 to vector<56x1xf32>
    %55 = arith.addf %51, %54 : vector<56x1xf32>
    %56 = math.rsqrt %55 : vector<56x1xf32>
    %57 = vector.broadcast %56 : vector<56x1xf32> to vector<56x128xf32>
    %58 = arith.mulf %53, %57 : vector<56x128xf32>
    %cst_22 = arith.constant 1.000000e+00 : f32
    %59 = vector.broadcast %cst_22 : f32 to vector<56x128xf32>
    %60 = arith.addf %59, %39 : vector<56x128xf32>
    %61 = arith.mulf %58, %60 : vector<56x128xf32>
    %62 = arith.addf %61, %38 : vector<56x128xf32>
    %63 = arith.truncf %62 : vector<56x128xf32> to vector<56x128xbf16>
    %c0_23 = arith.constant 0 : index
    %c0_24 = arith.constant 0 : index
    %64 = vector.load %arg7[%c0_23, %c0_24] : memref<128x128xbf16, #tpu.memory_space<vmem>>, vector<128x128xbf16>
    %cst_25 = arith.constant dense<0.000000e+00> : vector<56x128xf32>
    %65 = tpu.matmul %63, %64, %cst_25 {dimension_numbers = #tpu.dot_dimension_numbers<[1], [0], [0], [1], [0, 0, 1, 1], [], []>} : vector<56x128xbf16>, vector<128x128xbf16>, vector<56x128xf32> -> vector<56x128xf32>
    %c0_26 = arith.constant 0 : index
    %c0_27 = arith.constant 0 : index
    %66 = vector.load %arg8[%c0_26, %c0_27] : memref<1x128xf32, #tpu.memory_space<vmem>>, vector<1x128xf32>
    %67 = vector.broadcast %66 : vector<1x128xf32> to vector<56x128xf32>
    %68 = arith.addf %65, %67 : vector<56x128xf32>
    %69 = arith.negf %68 : vector<56x128xf32>
    %70 = math.exp %69 : vector<56x128xf32>
    %cst_28 = arith.constant 1.000000e+00 : f32
    %71 = vector.broadcast %cst_28 : f32 to vector<56x128xf32>
    %72 = arith.addf %71, %70 : vector<56x128xf32>
    %73 = arith.divf %71, %72 : vector<56x128xf32>
    %74 = arith.mulf %68, %73 : vector<56x128xf32>
    %75 = arith.truncf %74 : vector<56x128xf32> to vector<56x128xbf16>
    %c0_29 = arith.constant 0 : index
    %c0_30 = arith.constant 0 : index
    %76 = vector.load %arg9[%c0_29, %c0_30] : memref<128x128xbf16, #tpu.memory_space<vmem>>, vector<128x128xbf16>
    %cst_31 = arith.constant dense<0.000000e+00> : vector<56x128xf32>
    %77 = tpu.matmul %75, %76, %cst_31 {dimension_numbers = #tpu.dot_dimension_numbers<[1], [0], [0], [1], [0, 0, 1, 1], [], []>} : vector<56x128xbf16>, vector<128x128xbf16>, vector<56x128xf32> -> vector<56x128xf32>
    %c0_32 = arith.constant 0 : index
    %c0_33 = arith.constant 0 : index
    %78 = vector.load %arg10[%c0_32, %c0_33] : memref<1x128xf32, #tpu.memory_space<vmem>>, vector<1x128xf32>
    %79 = vector.broadcast %78 : vector<1x128xf32> to vector<56x128xf32>
    %80 = arith.addf %77, %79 : vector<56x128xf32>
    %81 = arith.mulf %40, %80 : vector<56x128xf32>
    %82 = arith.addf %0, %81 : vector<56x128xf32>
    %c0_34 = arith.constant 0 : index
    %c0_35 = arith.constant 0 : index
    %83 = vector.load %arg11[%c0_34, %c0_35] : memref<56x128xf32, #tpu.memory_space<vmem>>, vector<56x128xf32>
    tpu.vector_store %arg11[%c0_34, %c0_35], %82 {strides = array<i32>} : memref<56x128xf32, #tpu.memory_space<vmem>>, vector<56x128xf32>,
    return
  }
  func.func @transform_0(%arg0: i32) -> (i32, i32) {
    %c0_i32 = arith.constant 0 : i32
    %c0_i32_0 = arith.constant 0 : i32
    return %arg0, %c0_i32 : i32, i32
  }
  func.func @transform_1(%arg0: i32) -> (i32, i32) {
    %c0_i32 = arith.constant 0 : i32
    %c0_i32_0 = arith.constant 0 : i32
    return %arg0, %c0_i32 : i32, i32
  }
  func.func @transform_2(%arg0: i32) -> (i32, i32) {
    %c0_i32 = arith.constant 0 : i32
    %c0_i32_0 = arith.constant 0 : i32
    %c0_i32_1 = arith.constant 0 : i32
    return %c0_i32, %c0_i32_0 : i32, i32
  }
  func.func @transform_3(%arg0: i32) -> (i32, i32) {
    %c0_i32 = arith.constant 0 : i32
    %c0_i32_0 = arith.constant 0 : i32
    %c0_i32_1 = arith.constant 0 : i32
    return %c0_i32, %c0_i32_0 : i32, i32
  }
  func.func @transform_4(%arg0: i32) -> (i32, i32) {
    %c0_i32 = arith.constant 0 : i32
    %c0_i32_0 = arith.constant 0 : i32
    %c0_i32_1 = arith.constant 0 : i32
    return %c0_i32, %c0_i32_0 : i32, i32
  }
  func.func @transform_5(%arg0: i32) -> (i32, i32) {
    %c0_i32 = arith.constant 0 : i32
    %c0_i32_0 = arith.constant 0 : i32
    %c0_i32_1 = arith.constant 0 : i32
    return %c0_i32, %c0_i32_0 : i32, i32
  }
  func.func @transform_6(%arg0: i32) -> (i32, i32) {
    %c0_i32 = arith.constant 0 : i32
    %c0_i32_0 = arith.constant 0 : i32
    %c0_i32_1 = arith.constant 0 : i32
    return %c0_i32, %c0_i32_0 : i32, i32
  }
  func.func @transform_7(%arg0: i32) -> (i32, i32) {
    %c0_i32 = arith.constant 0 : i32
    %c0_i32_0 = arith.constant 0 : i32
    %c0_i32_1 = arith.constant 0 : i32
    return %c0_i32, %c0_i32_0 : i32, i32
  }
  func.func @transform_8(%arg0: i32) -> (i32, i32) {
    %c0_i32 = arith.constant 0 : i32
    %c0_i32_0 = arith.constant 0 : i32
    %c0_i32_1 = arith.constant 0 : i32
    return %c0_i32, %c0_i32_0 : i32, i32
  }
  func.func @transform_9(%arg0: i32) -> (i32, i32) {
    %c0_i32 = arith.constant 0 : i32
    %c0_i32_0 = arith.constant 0 : i32
    %c0_i32_1 = arith.constant 0 : i32
    return %c0_i32, %c0_i32_0 : i32, i32
  }
  func.func @transform_10(%arg0: i32) -> (i32, i32) {
    %c0_i32 = arith.constant 0 : i32
    %c0_i32_0 = arith.constant 0 : i32
    return %arg0, %c0_i32 : i32, i32
  }
}

</mosaic_0001>

<bundles_post_ra>
// kernel: tpu_custom_call.1
= control target key start
LH: loop header
LB: loop body
LE: loop exit
PB: predicated region body
PF: predicated region fallthrough
CT: control target
= control target key end

     0   :  { %s2792_s0 = inlined_call_operand.hbm [shape: f32[250,128], index: 0, kind: input, shape index: {}]   ;;  %s2793_s1 = inlined_call_operand.hbm [shape: f32[250,128], index: 1, kind: input, shape index: {}]   ;;  %s2794_s2 = inlined_call_operand.vmem [shape: f32[1,128], index: 2, kind: input, shape index: {}]   ;;  %s2795_s3 = inlined_call_operand.vmem [shape: f32[1,128], index: 3, kind: input, shape index: {}]   ;;  %s2796_s4 = inlined_call_operand.hbm [shape: bf16[128,384], index: 4, kind: input, shape index: {}]   ;;  %s2797_s5 = inlined_call_operand.vmem [shape: f32[1,384], index: 5, kind: input, shape index: {}]   ;;  %s2798_s6 = inlined_call_operand.hbm [shape: bf16[128,128], index: 6, kind: input, shape index: {}]   ;;  %s2799_s7 = inlined_call_operand.vmem [shape: f32[1,128], index: 7, kind: input, shape index: {}]   ;;  %s2800_s8 = inlined_call_operand.hbm [shape: bf16[128,128], index: 8, kind: input, shape index: {}]   ;;  %s2801_s9 = inlined_call_operand.vmem [shape: f32[1,128], index: 9, kind: input, shape index: {}]   ;;  %s2802_s10 = inlined_call_operand.hbm [shape: f32[250,128], index: 10, kind: output, shape index: {}]  }
   0x1   :  { %2809 = sst [smem:[#allocation21_spill]] %s2792_s0 }
   0x2   :  { %2810 = sst [smem:[#allocation22_spill]] %s2796_s4 }
   0x3   :  { %15 = vsyncpa [#allocation3], 0 }
   0x4   :  { %17 = vsyncpa [#allocation3 + $0x1], 0 }
   0x5   :  { %18 = vsyncpa [#allocation6], 0 }
   0x6   :  { %20 = vsyncpa [#allocation6 + $0x1], 0 }
   0x7   :  { %21 = vsyncpa [#allocation9], 0 }
   0x8   :  { %22 = vsyncpa [#allocation4], 0 }
   0x9   :  { %24 = vsyncpa [#allocation4 + $0x1], 0  ;;  %s2284_s13 = smov 0   ;;  %s2286_s14 = smov 0  }
   0xa   :  { %s2288_s15 = smov 0   ;;  %s2290_s16 = smov 0  }
   0xb LB: > { %2811 = sst [smem:[#allocation17_spill]] %s2198_s13  ;;  %s2305_s17 = sadd.s32 4294967295, %s2210_s16   ;;  %s2210_s16 = sphi %s2290_s16, %s2832_s16   ;;  %s2206_s15 = sphi %s2288_s15, %s2836_s15   ;;  %s2202_s14 = sphi %s2286_s14, %s2835_s14   ;;  %s2198_s13 = sphi %s2284_s13, %s2834_s13  }
   0xc   : > { %s1591_s18 = sadd.s32 4294967294, %s2210_s16   ;;  %s2309_s19 = sadd.s32 1, %s2210_s16  }
   0xd   : > { %2812 = sst [smem:[#allocation18_spill]] %s2309_s19  ;;  %s37_s20 = sadd.s32 1, %s2206_s15 }
   0xe   : > { %s34_s21 = ssub.s32 %s2210_s16, %s2309_s19  ;;  %p44_p0 = scmp.ne.s32.totalorder %s2206_s15, %s2202_s14 }
   0xf   : > { %p35_p1 = scmp.eq.s32.totalorder %s34_s21, 0  ;;  %p45_p2 = scmp.eq.s32.totalorder %s2210_s16, 0 }
  0x10   : > { %p50_p3 = scmp.ne.s32.totalorder %s2202_s14, %s2198_s13  ;;  %p2807_p4 = scmp.eq.s32.totalorder %s2305_s17, 0 }
  0x11   : > { %s2321_s22 = scalar_select %p35_p1, %s2206_s15, %s37_s20  }
  0x12   : > { %p2323_p5 = por %p45_p2, %p44_p0  ;;  %p2329_p6 = por %p2807_p4, %p50_p3 }
  0x13   : > { %2813 = sst [smem:[#allocation19_spill]] %s2321_s22  ;;  %p268_p7 = scmp.eq.s32.totalorder %s2305_s17, 4 }
  0x14   : > { %s2815_s24 = scalar_select %p2329_p6, 1, 0 }
  0x15   : > { %p274_p8 = scmp.eq.s32.totalorder %s1591_s18, 4  ;;  %p1592_p9 = scmp.ge.s32.totalorder %s2210_s16, 1 }
  0x16   : > { %p281_p10 = scmp.lt.s32.totalorder %s2210_s16, 6  ;;  %p2336_p11 = por %p268_p7, %p44_p0 }
  0x17   : > { %p2340_p12 = por %p274_p8, %p50_p3  ;;  %s2212_s28 = smov [#allocation8]  }
  0x18   : > { %s2816_s25 = scalar_select %p2336_p11, 1, 0 }
  0x19   : > { %s2817_s26 = scalar_select %p2340_p12, 1, 0 }
  0x1a   : > { %p2344_p13 = pnand %p1592_p9, %p281_p10  ;;  %s315_s29 = sshll.u32 %s2212_s28, 4  ;;  %s316_s29 = int_to_ptr.vmem [resolvable:$true] %s315_s29 }
  0x1b   : > { %2818 = sst [smem:[#allocation20_spill]] %s2817_s26  ;;  %s2213_s11 = smov [#allocation7]  }
  0x1c   : > { %p1805_p1 = pneg %p2344_p13  ;;  %s299_s12 = sshll.u32 %s2213_s11, 4  ;;  %s300_s12 = int_to_ptr.vmem [resolvable:$true] %s299_s12 }
  0x1d   : > { %s2015_s18 = scalar_lea.vmem %s316_s29, 1024  ;;  %p2023_p9 = scmp.lt.s32.totalorder %s316_s29, %s316_s29 }
  0x1e   : > { %p2352_p2 = pnand %p1805_p1, %p2807_p4  ;;  %p2016_p3 = scmp.ne.s32.totalorder %s316_s29, %s2015_s18 }
  0x1f   : > { %p2024_p10 = scmp.lt.s32.totalorder %s2015_s18, %s2015_s18 }
  0x20   : > { %p2006_p0 = pneg %p2352_p2 }
  0x21   : > { %p2025_p12 = por %p2024_p10, %p2023_p9 }
  0x22   : > { %p2018_p7 = pnand %p2016_p3, %p2006_p0 }
  0x24   : > { %p2019_p8 = pneg %p2018_p7 }
  0x26   : > { %p2026_p1 = pnand %p2025_p12, %p2019_p8 }
  0x28   : > { %2029 = shalt.err (!%p2026_p1)
}
  0x29   : > { %s2214_s20 = smov 64   ;;  %s2215_s21 = smov 4  }
  0x2a   : > { %1811 = dma.hbm_to_vmem [thread:$0]  (!%p2352_p2), %s2798_s6, 1024, %s316_s29, [#allocation9], %s2214_s20, %s2214_s20, %s2215_s21  }
  0x2b   : > { %s2041_s22 = scalar_lea.vmem %s300_s12, 3072  ;;  %p2049_p12 = scmp.lt.s32.totalorder %s300_s12, %s300_s12 }
  0x2c   : > { %p2042_p3 = scmp.ne.s32.totalorder %s300_s12, %s2041_s22  ;;  %p2050_p8 = scmp.lt.s32.totalorder %s2041_s22, %s2041_s22 }
  0x2e   : > { %p2044_p7 = pnand %p2042_p3, %p2006_p0  ;;  %p2051_p10 = por %p2050_p8, %p2049_p12 }
  0x30   : > { %p2045_p9 = pneg %p2044_p7 }
  0x32   : > { %p2052_p1 = pnand %p2051_p10, %p2045_p9 }
  0x34   : > { %2055 = shalt.err (!%p2052_p1)
}
  0x35   : > { %s2216_s18 = smov 192   ;;  %s2217_s19 = smov 12  }
  0x36   : > { %s2821_s4 = sld [smem:[#allocation22_spill]]  ;;  %s2218_s29 = smov [#allocation10]  }
  0x37   : > { %s331_s28 = sshll.u32 %s2218_s29, 4  ;;  %s332_s28 = int_to_ptr.vmem [resolvable:$true] %s331_s28 }
  0x38   : > { %s2067_s11 = scalar_lea.vmem %s332_s28, 1024  ;;  %p2075_p9 = scmp.lt.s32.totalorder %s332_s28, %s332_s28 }
  0x39   : > { %p2068_p3 = scmp.ne.s32.totalorder %s332_s28, %s2067_s11  ;;  %p2076_p8 = scmp.lt.s32.totalorder %s2067_s11, %s2067_s11 }
  0x3b   : > { %p2070_p7 = pnand %p2068_p3, %p2006_p0  ;;  %p2077_p10 = por %p2076_p8, %p2075_p9 }
  0x3c   : > { %1808 = dma.hbm_to_vmem [thread:$0]  (!%p2352_p2), %s2821_s4, 3072, %s300_s12, [#allocation6], %s2216_s18, %s2216_s18, %s2217_s19  }
  0x3d   : > { %p2071_p12 = pneg %p2070_p7 }
  0x3f   : > { %p2078_p1 = pnand %p2077_p10, %p2071_p12 }
  0x41   : > { %2081 = shalt.err (!%p2078_p1)
}
  0x42   : > { %1814 = dma.hbm_to_vmem [thread:$0]  (!%p2352_p2), %s2800_s8, 1024, %s332_s28, [#allocation9], %s2214_s20, %s2214_s20, %s2215_s21  }
  0x43   : > { %p1596_p4 = scmp.ge.s32.totalorder %s2210_s16, 5 }
  0x45   : > { %344 = sbr.rel (%p1596_p4) target bundleno = 147 (0x93), region = 48 }
  0x4a   : > { %347 = sbr.rel (!%p2323_p5) target bundleno = 113 (0x71), region = 52  ;;  %s348_s22 = sand.u32 (%p2323_p5), 1, %s2206_s15  }
  0x4b   : > { %s353_s26 = smul.u32 (%p2323_p5), 7, %s2210_s16  ;;  %s2396_s11 = scalar_lea.sflag (%p2323_p5), [#allocation3], %s348_s22 }
  0x4c   : > { %s1787_s12 = smul.u32 (%p2323_p5), 56, %s348_s22 }
  0x4d   : > { %s354_s18 = ssub.s32 (%p2323_p5), 32, %s353_s26 }
  0x4e   : > { %p355_p0 = scmp.lt.s32.totalorder (%p2323_p5), %s354_s18, 7  ;;  %s352_s20 = scalar_lea.vmem (%p2323_p5), [#allocation2], %s1787_s12 }
  0x50   : > { %s2838_s18 = smov (!%p355_p0, %s354_s18), 7 }
  0x51   : > { %s2393_s30 = sshll.u32 %s2838_s18, 7 }
  0x52   : > { %s359_s29 = ssub.s32 896, %s2393_s30 }
  0x53   : > { %360 = vsyncadd %s2396_s11, %s359_s29  ;;  %p1598_p4 = scmp.ne.s32.totalorder %s2393_s30, 0  ;;  %s1676_s21 = smul.u32 896, %s2210_s16 }
  0x54   : > { %s365_s28 = sshll.u32 %s352_s20, 4  ;;  %s2822_s0 = sld [smem:[#allocation21_spill]]  ;;  %s2406_s28 = int_to_ptr.vmem [resolvable:$true] %s365_s28 }
  0x5a   : > { %s2404_s26 = scalar_lea.hbm %s2822_s0, %s1676_s21  ;;  %s2086_s29 = scalar_lea.hbm %s2822_s0, 4096 }
  0x5b   : > { %s2082_s22 = scalar_lea.hbm %s2404_s26, %s2393_s30  ;;  %p2087_p12 = scmp.lt.s32.totalorder %s2404_s26, %s2822_s0 }
  0x5c   : > { %p2083_p2 = scmp.ne.s32.totalorder %s2404_s26, %s2082_s22  ;;  %p2088_p9 = scmp.lt.s32.totalorder %s2086_s29, %s2082_s22 }
  0x5e   : > { %p2084_p3 = pnand %p2083_p2, %p1598_p4  ;;  %p2089_p8 = por %p2088_p9, %p2087_p12 }
  0x60   : > { %p2085_p7 = pneg %p2084_p3 }
  0x62   : > { %p2090_p10 = pnand %p2089_p8, %p2085_p7 }
  0x64   : > { %2093 = shalt.err (!%p2090_p10)
}
  0x65   : > { %s2094_s21 = scalar_lea.vmem %s2406_s28, %s2393_s30  ;;  %s2219_s13 = smov [#allocation2]  }
  0x66   : > { %p2095_p1 = scmp.ne.s32.totalorder %s2406_s28, %s2094_s21  ;;  %s2098_s19 = sshll.u32 %s2219_s13, 4  ;;  %s2099_s19 = int_to_ptr.vmem [resolvable:$false] %s2098_s19 }
  0x67   : > { %s2100_s12 = scalar_lea.vmem %s2099_s19, 1792  ;;  %p2101_p3 = scmp.lt.s32.totalorder %s2406_s28, %s2099_s19 }
  0x68   : > { %p2096_p0 = pnand %p2095_p1, %p1598_p4  ;;  %p2102_p11 = scmp.lt.s32.totalorder %s2100_s12, %s2094_s21 }
  0x6a   : > { %p2097_p2 = pneg %p2096_p0  ;;  %p2103_p6 = por %p2102_p11, %p2101_p3 }
  0x6c   : > { %p2104_p12 = pnand %p2103_p6, %p2097_p2 }
  0x6e   : > { %2107 = shalt.err (!%p2104_p12)
}
  0x6f   : > { %s2220_s4 = smov 128   ;;  %s2221_s22 = smov 8  }
  0x70   : > { %371 = dma.hbm_to_vmem [thread:$0]  (%p1598_p4), %s2404_s26, %s2393_s30, %s2406_s28, %s2396_s11, %s2220_s4, %s2220_s4, %s2221_s22  }
  0x71 PF: > { %374 = sbr.rel (!%p2323_p5) target bundleno = 147 (0x93), region = 56  ;;  %s375_s18 = sand.u32 (%p2323_p5), 1, %s2210_s16  }
  0x72   : > { %s377_s29 = sand.u32 (%p2323_p5), 1, %s2206_s15   ;;  %s380_s21 = smul.u32 (%p2323_p5), 7, %s2210_s16 }
  0x73   : > { %s1788_s20 = smul.u32 (%p2323_p5), 56, %s377_s29  ;;  %s2440_s0 = scalar_lea.sflag (%p2323_p5), [#allocation6], %s375_s18 }
  0x74   : > { %s381_s13 = ssub.s32 (%p2323_p5), 32, %s380_s21 }
  0x75   : > { %p382_p6 = scmp.lt.s32.totalorder (%p2323_p5), %s381_s13, 7  ;;  %s379_s30 = scalar_lea.vmem (%p2323_p5), [#allocation5], %s1788_s20 }
  0x77   : > { %s2840_s13 = smov (!%p382_p6, %s381_s13), 7 }
  0x78   : > { %s2437_s19 = sshll.u32 %s2840_s13, 7 }
  0x79   : > { %s386_s12 = ssub.s32 896, %s2437_s19 }
  0x7a   : > { %387 = vsyncadd %s2440_s0, %s386_s12  ;;  %p1603_p5 = scmp.ne.s32.totalorder %s2437_s19, 0  ;;  %s1677_s23 = smul.u32 896, %s2210_s16 }
  0x7b   : > { %s392_s11 = sshll.u32 %s379_s30, 4  ;;  %s2112_s20 = scalar_lea.hbm %s2793_s1, 4096  ;;  %s2450_s11 = int_to_ptr.vmem [resolvable:$true] %s392_s11 }
  0x7c   : > { %s2448_s4 = scalar_lea.hbm %s2793_s1, %s1677_s23 }
  0x7d   : > { %s2108_s22 = scalar_lea.hbm %s2448_s4, %s2437_s19  ;;  %p2113_p9 = scmp.lt.s32.totalorder %s2448_s4, %s2793_s1 }
  0x7e   : > { %p2109_p11 = scmp.ne.s32.totalorder %s2448_s4, %s2108_s22  ;;  %p2114_p8 = scmp.lt.s32.totalorder %s2112_s20, %s2108_s22 }
  0x80   : > { %p2110_p4 = pnand %p2109_p11, %p1603_p5  ;;  %p2115_p10 = por %p2114_p8, %p2113_p9 }
  0x82   : > { %p2111_p7 = pneg %p2110_p4 }
  0x84   : > { %p2116_p1 = pnand %p2115_p10, %p2111_p7 }
  0x86   : > { %2119 = shalt.err (!%p2116_p1)
}
  0x87   : > { %s2120_s12 = scalar_lea.vmem %s2450_s11, %s2437_s19  ;;  %s2222_s30 = smov [#allocation5]  }
  0x88   : > { %p2121_p0 = scmp.ne.s32.totalorder %s2450_s11, %s2120_s12  ;;  %s2124_s23 = sshll.u32 %s2222_s30, 4  ;;  %s2125_s23 = int_to_ptr.vmem [resolvable:$false] %s2124_s23 }
  0x89   : > { %s2126_s28 = scalar_lea.vmem %s2125_s23, 1792  ;;  %p2127_p12 = scmp.lt.s32.totalorder %s2450_s11, %s2125_s23 }
  0x8a   : > { %p2122_p2 = pnand %p2121_p0, %p1603_p5  ;;  %p2128_p6 = scmp.lt.s32.totalorder %s2126_s28, %s2120_s12 }
  0x8c   : > { %p2123_p3 = pneg %p2122_p2  ;;  %p2129_p11 = por %p2128_p6, %p2127_p12 }
  0x8e   : > { %p2130_p4 = pnand %p2129_p11, %p2123_p3 }
  0x90   : > { %2133 = shalt.err (!%p2130_p4)
}
  0x91   : > { %s2223_s26 = smov 128   ;;  %s2224_s22 = smov 8  }
  0x92   : > { %398 = dma.hbm_to_vmem [thread:$0]  (%p1603_p5), %s2448_s4, %s2437_s19, %s2450_s11, %s2440_s0, %s2223_s26, %s2223_s26, %s2224_s22  }
  0x93 PF: > { %404 = sbr.rel (%p2344_p13) target bundleno = 1072 (0x430), region = 60  ;;  %s2479_s18 = sand.u32 (!%p2344_p13), 1, %s2202_s14  }
  0x94   : > { %s2482_s29 = smul.u32 (!%p2344_p13), 56, %s2479_s18  ;;  %s407_s20 = scalar_lea.sflag (!%p2344_p13), [#allocation3], %s2479_s18 }
  0x95   : > { %p2823_p7 = scmp.ne.s32.totalorder (!%p2344_p13), %s2815_s24, 0 }
  0x96   : > { %s2486_s21 = scalar_lea.vmem (!%p2344_p13), [#allocation2], %s2482_s29 }
  0x98   : > { %2177 = dma.done.wait (%p2823_p7), %s407_s20, 896  }
  0x99   : > { %2179 = vsyncadd (%p2823_p7), %s407_s20, 4294966400  ;;  %s415_s0 = sand.u32 1, %s2305_s17   ;;  %s419_s19 = scalar_lea.vmem [#allocation5], %s2482_s29 }
  0x9a   : > { %s416_s27 = scalar_lea.sflag [#allocation6], %s415_s0 }
  0x9b   : > { %2181 = dma.done.wait (%p2823_p7), %s416_s27, 896  }
  0x9c   : > { %2183 = vsyncadd (%p2823_p7), %s416_s27, 4294966400  ;;  %p2824_p13 = scmp.eq.s32.totalorder %s2305_s17, 0 }
  0x9e   : > { %2185 = dma.done.wait (%p2824_p13), [#allocation6], 3072   ;;  %p2825_p5 = pmov %p2824_p13 }
  0xa0   : > { %2187 = vsyncadd (%p2825_p5), [#allocation6], 4294964224  ;;  %p2826_p9 = pmov %p2825_p5 }
  0xa1   : > { %p2827_p8 = pmov %p2825_p5 }
  0xa2   : > { %2189 = dma.done.wait (%p2826_p9), [#allocation9], 2048  }
  0xa3   : > { %2191 = vsyncadd (%p2827_p8), [#allocation9], 4294965248  ;;  %v2506_v0 = vld [vmem:[%s419_s19] sm:$0xff]  ;;  %v2508_v1 = vld [vmem:[%s419_s19 + $0x8] sm:$0xff]  ;;  %v2225_v25 = vmov 0   ;;  %s2714_s20 = scalar_lea.vmem [#allocation11], %s2482_s29 }
  0xa4   : > { %503 = vadd.xlane.f32.xlu0 %v2506_v0  ;;  %v524_v2 = vmul.f32 %v2506_v0, %v2506_v0  ;;  %v525_v3 = vmul.f32 %v2508_v1, %v2508_v1  ;;  %v2515_v4 = vld [vmem:[%s419_s19 + $0x10] sm:$0xff]  ;;  %v2518_v5 = vld [vmem:[%s419_s19 + $0x18] sm:$0xff]  ;;  %v2526_v8 = vld [vmem:[%s419_s19 + $0x20] sm:$0xff]  ;;  %884 = vmatprep.mubr.bf16.mxu0 %v2225_v25  ;;  %s1448_s29 = scalar_lea.sflag [#allocation4], %s2479_s18  ;;  %p2828_p10 = scmp.ne.s32.totalorder %s2816_s25, 0 }
  0xa5   : > { %v526_v6 = vmul.f32 %v2515_v4, %v2515_v4  ;;  %v527_v7 = vmul.f32 %v2518_v5, %v2518_v5  ;;  %v2528_v9 = vld [vmem:[%s419_s19 + $0x28] sm:$0xff]  ;;  %v528_v10 = vmul.f32 %v2526_v8, %v2526_v8  ;;  %v2533_v11 = vld [vmem:[%s419_s19 + $0x30] sm:$0xff]  ;;  %v2547_v40 = vld [vmem:[%s2486_s21 + $0x8] sm:$0xff] }
  0xa6   : > { %531 = vadd.xlane.f32.xlu1 %v524_v2  ;;  %v529_v12 = vmul.f32 %v2528_v9, %v2528_v9  ;;  %v530_v13 = vmul.f32 %v2533_v11, %v2533_v11  ;;  %v1872_v14 = vld [vmem:[#allocation7 + $0xac] ss:$12 sps:$4 sm:$0xff]   ;;  %v1874_v15 = vld [vmem:[#allocation7 + $0xa8] ss:$12 sps:$4 sm:$0xff]   ;;  %v1880_v17 = vld [vmem:[#allocation7 + $0xb0] ss:$12 sps:$4 sm:$0xff]   ;;  %v1009_v44 = vmul.f32 %v2547_v40, %v2547_v40 }
  0xa7   : > { %v1875_v16 = vld [vmem:[#allocation7 + $0x94] ss:$12 sps:$4 sm:$0xff]   ;;  %852 = vmatprep.subr.bf16.mxu0 %v1872_v14  ;;  %v1884_v18 = vld [vmem:[#allocation7 + $0x98] ss:$12 sps:$4 sm:$0xff]   ;;  %v1877_v19 = vld [vmem:[#allocation7 + $0x90] ss:$12 sps:$4 sm:$0xff]   ;;  %1715 = vmatprep.subr.bf16.mxu1 %v1880_v17 }
  0xa8   : > { %505 = vadd.xlane.f32.xlu0 %v2508_v1  ;;  %853 = vmatpush1.bf16.msra.mxu0 %v1874_v15  ;;  %v1878_v20 = vld [vmem:[#allocation7 + $0x7c] ss:$12 sps:$4 sm:$0xff]   ;;  %v1888_v21 = vld [vmem:[#allocation7 + $0x80] ss:$12 sps:$4 sm:$0xff]   ;;  %v1881_v22 = vld [vmem:[#allocation7 + $0x78] ss:$12 sps:$4 sm:$0xff]  }
  0xa9   : > { %854 = vmatprep.subr.bf16.mxu0 %v1875_v16  ;;  %1716 = vmatpush3.bf16.msra.mxu1 %v1880_v17  ;;  %v1882_v23 = vld [vmem:[#allocation7 + $0x64] ss:$12 sps:$4 sm:$0xff]   ;;  %v1892_v24 = vld [vmem:[#allocation7 + $0x68] ss:$12 sps:$4 sm:$0xff]   ;;  %v1885_v26 = vld [vmem:[#allocation7 + $0x60] ss:$12 sps:$4 sm:$0xff]  }
  0xaa   : > { %533 = vadd.xlane.f32.xlu1 %v525_v3  ;;  %1717 = vmatprep.subr.bf16.mxu1 %v1884_v18  ;;  %v1886_v27 = vld [vmem:[#allocation7 + $0x4c] ss:$12 sps:$4 sm:$0xff]   ;;  %v1896_v28 = vld [vmem:[#allocation7 + $0x50] ss:$12 sps:$4 sm:$0xff]   ;;  %v1889_v29 = vld [vmem:[#allocation7 + $0x48] ss:$12 sps:$4 sm:$0xff]  }
  0xab   : > { %v1890_v30 = vld [vmem:[#allocation7 + $0x34] ss:$12 sps:$4 sm:$0xff]   ;;  %v1900_v31 = vld [vmem:[#allocation7 + $0x38] ss:$12 sps:$4 sm:$0xff]   ;;  %v1893_v32 = vld [vmem:[#allocation7 + $0x30] ss:$12 sps:$4 sm:$0xff]  }
  0xac   : > { %507 = vadd.xlane.f32.xlu0 %v2515_v4  ;;  %855 = vmatpush1.bf16.msra.mxu0 %v1877_v19  ;;  %v1894_v33 = vld [vmem:[#allocation7 + $0x1c] ss:$12 sps:$4 sm:$0xff]   ;;  %v1897_v34 = vld [vmem:[#allocation7 + $0x18] ss:$12 sps:$4 sm:$0xff]   ;;  %v1901_v36 = vld [vmem:[#allocation7] ss:$12 sps:$4 sm:$0xff]  }
  0xad   : > { %856 = vmatprep.subr.bf16.mxu0 %v1878_v20  ;;  %1718 = vmatpush3.bf16.msra.mxu1 %v1884_v18  ;;  %v1898_v35 = vld [vmem:[#allocation7 + $0x4] ss:$12 sps:$4 sm:$0xff]   ;;  %v1902_v37 = vld [vmem:[#allocation7 + $0x20] ss:$12 sps:$4 sm:$0xff]   ;;  %v1903_v38 = vld [vmem:[#allocation7 + $0x8] ss:$12 sps:$4 sm:$0xff]  }
  0xae   : > { %509 = vadd.xlane.f32.xlu1 %v2518_v5  ;;  %1719 = vmatprep.subr.bf16.mxu1 %v1888_v21  ;;  %v2543_v39 = vld [vmem:[%s2486_s21] sm:$0xff]  ;;  %v2551_v41 = vld [vmem:[%s2486_s21 + $0x10] sm:$0xff]  ;;  %v2554_v42 = vld [vmem:[%s2486_s21 + $0x18] sm:$0xff] }
  0xaf   : > { %v1008_v43 = vmul.f32 %v2543_v39, %v2543_v39  ;;  %v1010_v45 = vmul.f32 %v2551_v41, %v2551_v41  ;;  %v1011_v46 = vmul.f32 %v2554_v42, %v2554_v42  ;;  %v2567_v47 = vld [vmem:[%s2486_s21 + $0x20] sm:$0xff]  ;;  %v2570_v48 = vld [vmem:[%s2486_s21 + $0x28] sm:$0xff]  ;;  %v2577_v50 = vld [vmem:[%s2486_s21 + $0x30] sm:$0xff]  ;;  %s1455_s21 = smul.u32 (%p2828_p10), 7, %s2305_s17 }
  0xb0   : > { %535 = vadd.xlane.f32.xlu0 %v526_v6  ;;  %857 = vmatpush1.bf16.msra.mxu0 %v1881_v22  ;;  %v1012_v49 = vmul.f32 %v2567_v47, %v2567_v47  ;;  %v1013_v51 = vmul.f32 %v2570_v48, %v2570_v48  ;;  %v1014_v52 = vmul.f32 %v2577_v50, %v2577_v50  ;;  %v2584_v53 = vld [vmem:[#allocation8 + $0x38] sm:$0xff]  }
  0xb1   : > { %858 = vmatprep.subr.bf16.mxu0 %v1882_v23  ;;  %1720 = vmatpush3.bf16.msra.mxu1 %v1888_v21  ;;  %s1456_s0 = ssub.s32 (%p2828_p10), 32, %s1455_s21 }
  0xb2   : > { %537 = vadd.xlane.f32.xlu1 %v527_v7  ;;  %1721 = vmatprep.subr.bf16.mxu1 %v1892_v24  ;;  %p1457_p1 = scmp.lt.s32.totalorder (%p2828_p10), %s1456_s0, 7 }
  0xb4   : > { %511 = vadd.xlane.f32.xlu0 %v2526_v8  ;;  %859 = vmatpush1.bf16.msra.mxu0 %v1885_v26 }
  0xb5   : > { %860 = vmatprep.subr.bf16.mxu0 %v1886_v27  ;;  %1722 = vmatpush3.bf16.msra.mxu1 %v1892_v24 }
  0xb6   : > { %513 = vadd.xlane.f32.xlu1 %v2528_v9  ;;  %1723 = vmatprep.subr.bf16.mxu1 %v1896_v28 }
  0xb8   : > { %539 = vadd.xlane.f32.xlu0 %v528_v10  ;;  %861 = vmatpush1.bf16.msra.mxu0 %v1889_v29 }
  0xb9   : > { %862 = vmatprep.subr.bf16.mxu0 %v1890_v30  ;;  %1724 = vmatpush3.bf16.msra.mxu1 %v1896_v28 }
  0xba   : > { %541 = vadd.xlane.f32.xlu1 %v529_v12  ;;  %1725 = vmatprep.subr.bf16.mxu1 %v1900_v31 }
  0xbc   : > { %515 = vadd.xlane.f32.xlu0 %v2533_v11  ;;  %863 = vmatpush1.bf16.msra.mxu0 %v1893_v32 }
  0xbd   : > { %864 = vmatprep.subr.bf16.mxu0 %v1894_v33  ;;  %1726 = vmatpush3.bf16.msra.mxu1 %v1900_v31 }
  0xbe   : > { %543 = vadd.xlane.f32.xlu1 %v530_v13  ;;  %1727 = vmatprep.subr.bf16.mxu1 %v1902_v37 }
  0xc0   : > { %865 = vmatpush1.bf16.msra.mxu0 %v1897_v34  ;;  %987 = vadd.xlane.f32.xlu0 %v2543_v39 }
  0xc1   : > { %866 = vmatprep.subr.bf16.mxu0 %v1898_v35  ;;  %1728 = vmatpush3.bf16.msra.mxu1 %v1902_v37 }
  0xc2   : > { %1729 = vmatprep.subr.bf16.mxu1 %v1903_v38  ;;  %989 = vadd.xlane.f32.xlu1 %v2547_v40 }
  0xc4   : > { %867 = vmatpush1.bf16.msra.mxu0 %v1901_v36  ;;  %991 = vadd.xlane.f32.xlu0 %v2551_v41  ;;  %v2591_v36 = vld [vmem:[%s2794_s2] ss:$0 sm:$0xff] }
  0xc5   : > { %1730 = vmatpush3.bf16.msra.mxu1 %v1903_v38  ;;  %1739 = vmatprep.subr.bf16.mxu0 %v2584_v53 }
  0xc6   : > { %993 = vadd.xlane.f32.xlu1 %v2554_v42 }
  0xc8   : > { %1015 = vadd.xlane.f32.xlu0 %v1008_v43 }
  0xca   : > { %1017 = vadd.xlane.f32.xlu1 %v1009_v44 }
  0xcc   : > { %1019 = vadd.xlane.f32.xlu0 %v1010_v45 }
  0xce   : > { %1021 = vadd.xlane.f32.xlu1 %v1011_v46 }
  0xd0   : > { %995 = vadd.xlane.f32.xlu0 %v2567_v47 }
  0xd2   : > { %997 = vadd.xlane.f32.xlu1 %v2570_v48 }
  0xd4   : > { %999 = vadd.xlane.f32.xlu0 %v2577_v50 }
  0xd6   : > { %1023 = vadd.xlane.f32.xlu1 %v1012_v49 }
  0xd8   : > { %1025 = vadd.xlane.f32.xlu0 %v1013_v51 }
  0xda   : > { %1027 = vadd.xlane.f32.xlu1 %v1014_v52 }
 0x12d   : > { %v504_v54 = vpop.xlane.xlu0 %503 }
 0x12e   : > { %v517_v55 = vmul.f32 0.0078125, %v504_v54 }
 0x12f   : > { %v532_v56 = vpop.xlane.xlu1 %531 }
 0x130   : > { %v552_v57 = vmul.f32 %v517_v55, %v517_v55  ;;  %v545_v58 = vmul.f32 0.0078125, %v532_v56  ;;  %v566_v32 = vsub.f32 %v2506_v0, %v517_v55  ;;  %v1612_v0 = vld [vmem:[%s2795_s3] ss:$0 sm:$0xff] }
 0x131   : > { %v506_v59 = vpop.xlane.xlu0 %505 }
 0x132   : > { %v559_v60 = vsub.f32 %v545_v58, %v552_v57  ;;  %v518_v61 = vmul.f32 0.0078125, %v506_v59 }
 0x133   : > { %v534_v62 = vpop.xlane.xlu1 %533 }
 0x134   : > { %v573_v63 = vadd.f32 1e-06, %v559_v60  ;;  %v553_v2 = vmul.f32 %v518_v61, %v518_v61  ;;  %v546_v3 = vmul.f32 0.0078125, %v534_v62  ;;  %v567_v55 = vsub.f32 %v2508_v1, %v518_v61 }
 0x135   : > { %v508_v6 = vpop.xlane.xlu0 %507 }
 0x136   : > { %1920 = vrsqrt.f32 %v573_v63  ;;  %v560_v7 = vsub.f32 %v546_v3, %v553_v2  ;;  %v519_v10 = vmul.f32 0.0078125, %v508_v6 }
 0x137   : > { %v510_v12 = vpop.xlane.xlu1 %509 }
 0x138   : > { %v574_v13 = vadd.f32 1e-06, %v560_v7  ;;  %v554_v14 = vmul.f32 %v519_v10, %v519_v10  ;;  %v520_v15 = vmul.f32 0.0078125, %v510_v12  ;;  %v568_v6 = vsub.f32 %v2515_v4, %v519_v10 }
 0x139   : > { %v536_v16 = vpop.xlane.xlu0 %535 }
 0x13a   : > { %1922 = vrsqrt.f32 %v574_v13  ;;  %v547_v17 = vmul.f32 0.0078125, %v536_v16  ;;  %v555_v19 = vmul.f32 %v520_v15, %v520_v15  ;;  %v569_v1 = vsub.f32 %v2518_v5, %v520_v15 }
 0x13b   : > { %v538_v18 = vpop.xlane.xlu1 %537 }
 0x13c   : > { %v561_v20 = vsub.f32 %v547_v17, %v554_v14  ;;  %v548_v21 = vmul.f32 0.0078125, %v538_v18 }
 0x13d   : > { %v512_v22 = vpop.xlane.xlu0 %511 }
 0x13e   : > { %v575_v23 = vadd.f32 1e-06, %v561_v20  ;;  %v562_v24 = vsub.f32 %v548_v21, %v555_v19  ;;  %v521_v26 = vmul.f32 0.0078125, %v512_v22 }
 0x13f   : > { %v514_v27 = vpop.xlane.xlu1 %513 }
 0x140   : > { %1924 = vrsqrt.f32 %v575_v23  ;;  %v576_v28 = vadd.f32 1e-06, %v562_v24  ;;  %v556_v29 = vmul.f32 %v521_v26, %v521_v26  ;;  %v522_v30 = vmul.f32 0.0078125, %v514_v27 }
 0x141   : > { %v540_v31 = vpop.xlane.xlu0 %539  ;;  %v570_v21 = vsub.f32 %v2526_v8, %v521_v26 }
 0x142   : > { %1926 = vrsqrt.f32 %v576_v28  ;;  %v549_v33 = vmul.f32 0.0078125, %v540_v31  ;;  %v557_v37 = vmul.f32 %v522_v30, %v522_v30  ;;  %v571_v23 = vsub.f32 %v2528_v9, %v522_v30 }
 0x143   : > { %v1921_v34 = vpop.eup %1920  ;;  %v542_v35 = vpop.xlane.xlu1 %541 }
 0x144   : > { %v563_v38 = vsub.f32 %v549_v33, %v556_v29  ;;  %v550_v43 = vmul.f32 0.0078125, %v542_v35  ;;  %v587_v44 = vmul.f32 %v1921_v34, %v566_v32 }
 0x145   : > { %v516_v45 = vpop.xlane.xlu0 %515 }
 0x146   : > { %v577_v46 = vadd.f32 1e-06, %v563_v38  ;;  %v564_v49 = vsub.f32 %v550_v43, %v557_v37  ;;  %v523_v51 = vmul.f32 0.0078125, %v516_v45  ;;  %v601_v52 = vmul.f32 %v2591_v36, %v587_v44 }
 0x147   : > { %v1923_v54 = vpop.eup %1922  ;;  %v544_v56 = vpop.xlane.xlu1 %543 }
 0x148   : > { %1928 = vrsqrt.f32 %v577_v46  ;;  %v578_v57 = vadd.f32 1e-06, %v564_v49  ;;  %v558_v58 = vmul.f32 %v523_v51, %v523_v51  ;;  %v551_v59 = vmul.f32 0.0078125, %v544_v56 }
 0x149   : > { %v588_v60 = vmul.f32 %v1923_v54, %v567_v55  ;;  %v2598_v62 = vadd.f32 %v1612_v0, %v601_v52  ;;  %v572_v33 = vsub.f32 %v2533_v11, %v523_v51 }
 0x14a   : > { %1930 = vrsqrt.f32 %v578_v57  ;;  %v565_v63 = vsub.f32 %v551_v59, %v558_v58 }
 0x14b   : > { %v602_v2 = vmul.f32 %v2591_v36, %v588_v60  ;;  %v1613_v3 = vmul.f32 -1.442695, %v2598_v62  ;;  %v1905_v60 = vld [vmem:[#allocation8 + $0x30] sm:$0xff]  }
 0x14c   : > { %v579_v12 = vadd.f32 1e-06, %v565_v63 }
 0x14d   : > { %v1925_v7 = vpop.eup %1924  ;;  %v616_v13 = vadd.f32 %v1612_v0, %v602_v2  ;;  %1932 = vpow2.f32 %v1613_v3 }
 0x14e   : > { %v589_v61 = vmul.f32 %v1925_v7, %v568_v6  ;;  %1934 = vrsqrt.f32 %v579_v12 }
 0x14f   : > { %v1927_v14 = vpop.eup %1926  ;;  %v1614_v16 = vmul.f32 -1.442695, %v616_v13 }
 0x150   : > { %v590_v17 = vmul.f32 %v1927_v14, %v569_v1  ;;  %v603_v18 = vmul.f32 %v2591_v36, %v589_v61 }
 0x151   : > { %1936 = vpow2.f32 %v1614_v16 }
 0x152   : > { %v604_v19 = vmul.f32 %v2591_v36, %v590_v17  ;;  %v617_v20 = vadd.f32 %v1612_v0, %v603_v18 }
 0x154   : > { %v618_v4 = vadd.f32 %v1612_v0, %v604_v19  ;;  %v1615_v10 = vmul.f32 -1.442695, %v617_v20  ;;  %v1906_v19 = vld [vmem:[#allocation8 + $0x28] sm:$0xff]  }
 0x155   : > { %v1929_v22 = vpop.eup %1928 }
 0x156   : > { %1938 = vpow2.f32 %v1615_v10  ;;  %v1616_v5 = vmul.f32 -1.442695, %v618_v4  ;;  %v591_v15 = vmul.f32 %v1929_v22, %v570_v21  ;;  %v1908_v21 = vld [vmem:[#allocation8 + $0x18] sm:$0xff]   ;;  %v1910_v10 = vld [vmem:[#allocation8 + $0x8] sm:$0xff]   ;;  %v1911_v22 = vld [vmem:[#allocation8] sm:$0xff]  }
 0x157   : > { %v1931_v24 = vpop.eup %1930 }
 0x158   : > { %1940 = vpow2.f32 %v1616_v5  ;;  %v592_v27 = vmul.f32 %v1931_v24, %v571_v23  ;;  %v605_v28 = vmul.f32 %v2591_v36, %v591_v15  ;;  %v990_v23 = vpop.xlane.xlu1 %989 }
 0x15a   : > { %v1933_v29 = vpop.eup %1932  ;;  %v606_v31 = vmul.f32 %v2591_v36, %v592_v27  ;;  %v619_v32 = vadd.f32 %v1612_v0, %v605_v28 }
 0x15b   : > { %v643_v8 = vadd.f32 1.0, %v1933_v29  ;;  %v1935_v26 = vpop.eup %1934 }
 0x15c   : > { %v620_v34 = vadd.f32 %v1612_v0, %v606_v31  ;;  %v1617_v35 = vmul.f32 -1.442695, %v619_v32  ;;  %v593_v37 = vmul.f32 %v1935_v26, %v572_v33  ;;  %v994_v15 = vpop.xlane.xlu1 %993  ;;  %v2619_v31 = vmul.f32 0.0078125, %v990_v23 }
 0x15e   : > { %v1937_v9 = vpop.eup %1936  ;;  %1942 = vpow2.f32 %v1617_v35  ;;  %v1618_v30 = vmul.f32 -1.442695, %v620_v34  ;;  %v607_v43 = vmul.f32 %v2591_v36, %v593_v37 }
 0x15f   : > { %v644_v38 = vadd.f32 1.0, %v1937_v9  ;;  %1944 = vrcp.f32 %v643_v8  ;;  %v1037_v8 = vmul.f32 %v2619_v31, %v2619_v31 }
 0x160   : > { %1946 = vpow2.f32 %v1618_v30  ;;  %v621_v44 = vadd.f32 %v1612_v0, %v607_v43  ;;  %v1018_v28 = vpop.xlane.xlu1 %1017  ;;  %v2627_v30 = vmul.f32 0.0078125, %v994_v15 }
 0x161   : > { %1948 = vrcp.f32 %v644_v38  ;;  %v1030_v26 = vmul.f32 0.0078125, %v1018_v28 }
 0x162   : > { %v1619_v46 = vmul.f32 -1.442695, %v621_v44 }
 0x163   : > { %v1939_v45 = vpop.eup %1938  ;;  %v1044_v38 = vsub.f32 %v1030_v26, %v1037_v8 }
 0x164   : > { %v645_v49 = vadd.f32 1.0, %v1939_v45  ;;  %1950 = vpow2.f32 %v1619_v46 }
 0x165   : > { %v1941_v52 = vpop.eup %1940 }
 0x166   : > { %v646_v11 = vadd.f32 1.0, %v1941_v52  ;;  %1952 = vrcp.f32 %v645_v49  ;;  %v1039_v52 = vmul.f32 %v2627_v30, %v2627_v30 }
 0x168   : > { %1954 = vrcp.f32 %v646_v11  ;;  %v1058_v11 = vadd.f32 1e-06, %v1044_v38 }
 0x16b   : > { %v1943_v51 = vpop.eup %1942 }
 0x16c   : > { %v1945_v54 = vpop.eup %1944  ;;  %v647_v55 = vadd.f32 1.0, %v1943_v51 }
 0x16d   : > { %v1947_v56 = vpop.eup %1946  ;;  %v664_v36 = vmul.f32 %v1945_v54, %v2598_v62  ;;  %v709_v54 = vlaneseq }
 0x16e   : > { %v1949_v57 = vpop.eup %1948  ;;  %v648_v58 = vadd.f32 1.0, %v1947_v56  ;;  %1956 = vrcp.f32 %v647_v55 }
 0x16f   : > { %v665_v59 = vmul.f32 %v1949_v57, %v616_v13 }
 0x170   : > { %1958 = vrcp.f32 %v648_v58 }
 0x171   : > { %v671_v0 = vpack.c.bf16 %v665_v59, %v664_v36  ;;  %v1951_v63 = vpop.eup %1950  ;;  %v2637_v59 = vshrl.u32 %v709_v54, 7 }
 0x172   : > { %v649_v3 = vadd.f32 1.0, %v1951_v63 }
 0x173   : > { %v1953_v2 = vpop.eup %1952  ;;  %885 = vmatmul.mubr.bf16.vlgmr.msra.gmra.mxu0 %v671_v0  ;;  %1731 = vmatprep.mubr.bf16.mxu1 %v671_v0 }
 0x174   : > { %894 = vmatprep.mubr.bf16.mxu0 %v2225_v25  ;;  %1740 = vmatpush3.bf16.msra.mxu0 %v2584_v53  ;;  %1960 = vrcp.f32 %v649_v3  ;;  %v666_v7 = vmul.f32 %v1953_v2, %v617_v20  ;;  %v1907_v20 = vld [vmem:[#allocation8 + $0x20] sm:$0xff]   ;;  %v715_v3 = vsub.s32 1, %v2637_v59 }
 0x175   : > { %v1955_v6 = vpop.eup %1954  ;;  %1741 = vmatprep.subr.bf16.mxu0 %v1905_v60 }
 0x176   : > { %v667_v12 = vmul.f32 %v1955_v6, %v618_v4  ;;  %v1909_v4 = vld [vmem:[#allocation8 + $0x10] sm:$0xff]  }
 0x178   : > { %v672_v1 = vpack.c.bf16 %v667_v12, %v666_v7  ;;  %1742 = vmatpush3.bf16.msra.mxu0 %v1905_v60 }
 0x179   : > { %1743 = vmatprep.subr.bf16.mxu0 %v1906_v19 }
 0x17a   : > { %1732 = vmatmul.mubr.bf16.vlgmr.msra.gmra.mxu1 %v672_v1 }
 0x17b   : > { %v1957_v62 = vpop.eup %1956  ;;  %895 = vmatmul.mubr.bf16.gmra.mxu0 %v672_v1 }
 0x17c   : > { %904 = vmatprep.mubr.bf16.mxu0 %v2225_v25  ;;  %v668_v61 = vmul.f32 %v1957_v62, %v619_v32  ;;  %1744 = vmatpush3.bf16.msra.mxu0 %v1906_v19 }
 0x17d   : > { %v1959_v13 = vpop.eup %1958  ;;  %1745 = vmatprep.subr.bf16.mxu0 %v1907_v20 }
 0x17e   : > { %v669_v14 = vmul.f32 %v1959_v13, %v620_v34  ;;  %v1022_v34 = vpop.xlane.xlu1 %1021  ;;  %v2649_v13 = vld [vmem:[%s2797_s5] sm:$0x7] }
 0x17f   : > { %v1032_v51 = vmul.f32 0.0078125, %v1022_v34 }
 0x180   : > { %v673_v16 = vpack.c.bf16 %v669_v14, %v668_v61  ;;  %1746 = vmatpush3.bf16.msra.mxu0 %v1907_v20  ;;  %v2652_v14 = vrot.slane %v2649_v13, %v715_v3 }
 0x181   : > { %v1961_v17 = vpop.eup %1960  ;;  %1747 = vmatprep.subr.bf16.mxu0 %v1908_v21  ;;  %v1046_v58 = vsub.f32 %v1032_v51, %v1039_v52  ;;  %v1053_v51 = vsub.f32 %v2554_v42, %v2627_v30 }
 0x182   : > { %1735 = vmatprep.mubr.bf16.mxu1 %v673_v16  ;;  %v670_v53 = vmul.f32 %v1961_v17, %v621_v44  ;;  %v998_v43 = vpop.xlane.xlu1 %997 }
 0x183   : > { %905 = vmatmul.mubr.bf16.gmra.mxu0 %v673_v16  ;;  %v2635_v36 = vmul.f32 0.0078125, %v998_v43  ;;  %v1060_v7 = vadd.f32 1e-06, %v1046_v58 }
 0x184   : > { %914 = vmatprep.mubr.bf16.mxu0 %v2225_v25  ;;  %v674_v18 = vpack.c.bf16 %v670_v53, %v670_v53  ;;  %1748 = vmatpush3.bf16.msra.mxu0 %v1908_v21  ;;  %v988_v25 = vpop.xlane.xlu0 %987 }
 0x185   : > { %1749 = vmatprep.subr.bf16.mxu0 %v1909_v4  ;;  %v2617_v27 = vmul.f32 0.0078125, %v988_v25  ;;  %v1041_v12 = vmul.f32 %v2635_v36, %v2635_v36 }
 0x186   : > { %1736 = vmatmul.mubr.bf16.gmra.mxu1 %v674_v18  ;;  %v1024_v57 = vpop.xlane.xlu1 %1023 }
 0x187   : > { %v1036_v32 = vmul.f32 %v2617_v27, %v2617_v27  ;;  %v1033_v2 = vmul.f32 0.0078125, %v1024_v57  ;;  %v1050_v20 = vsub.f32 %v2543_v39, %v2617_v27 }
 0x188   : > { %1750 = vmatpush3.bf16.msra.mxu0 %v1909_v4  ;;  %v992_v5 = vpop.xlane.xlu0 %991  ;;  %v711_v4 = vsub.s32 0, %v2637_v59 }
 0x189   : > { %1751 = vmatprep.subr.bf16.mxu0 %v1910_v10  ;;  %v2625_v37 = vmul.f32 0.0078125, %v992_v5  ;;  %v1051_v5 = vsub.f32 %v2547_v40, %v2619_v31 }
 0x18a   : > { %v1028_v62 = vpop.xlane.xlu1 %1027 }
 0x18b   : > { %915 = vmatmul.mubr.bf16.gmra.mxu0 %v674_v18  ;;  %v1038_v44 = vmul.f32 %v2625_v37, %v2625_v37  ;;  %v1035_v17 = vmul.f32 0.0078125, %v1028_v62  ;;  %v1052_v31 = vsub.f32 %v2551_v41, %v2625_v37 }
 0x18c   : > { %1752 = vmatpush3.bf16.msra.mxu0 %v1910_v10  ;;  %v1016_v24 = vpop.xlane.xlu0 %1015 }
 0x18d   : > { %1753 = vmatprep.subr.bf16.mxu0 %v1911_v22  ;;  %v1029_v33 = vmul.f32 0.0078125, %v1016_v24 }
 0x18f   : > { %v1043_v9 = vsub.f32 %v1029_v33, %v1036_v32  ;;  %v2663_v32 = vrot.slane %v2649_v13, %v711_v4 }
 0x190   : > { %1754 = vmatpush3.bf16.msra.mxu0 %v1911_v22  ;;  %v1020_v29 = vpop.xlane.xlu0 %1019 }
 0x191   : > { %v1057_v45 = vadd.f32 1e-06, %v1043_v9  ;;  %v1031_v46 = vmul.f32 0.0078125, %v1020_v29 }
 0x193   : > { %1962 = vrsqrt.f32 %v1057_v45  ;;  %v1045_v55 = vsub.f32 %v1031_v46, %v1038_v44 }
 0x194   : > { %v996_v35 = vpop.xlane.xlu0 %995  ;;  %1964 = vrsqrt.f32 %v1058_v11 }
 0x195   : > { %v2633_v56 = vmul.f32 0.0078125, %v996_v35  ;;  %v1059_v60 = vadd.f32 1e-06, %v1045_v55 }
 0x197   : > { %v1040_v63 = vmul.f32 %v2633_v56, %v2633_v56  ;;  %1966 = vrsqrt.f32 %v1059_v60  ;;  %v1054_v30 = vsub.f32 %v2567_v47, %v2633_v56 }
 0x198   : > { %v1000_v49 = vpop.xlane.xlu0 %999  ;;  %1968 = vrsqrt.f32 %v1060_v7 }
 0x199   : > { %v2642_v6 = vmul.f32 0.0078125, %v1000_v49  ;;  %v1047_v61 = vsub.f32 %v1033_v2, %v1040_v63 }
 0x19b   : > { %v1042_v16 = vmul.f32 %v2642_v6, %v2642_v6  ;;  %v1061_v21 = vadd.f32 1e-06, %v1047_v61 }
 0x19c   : > { %v1026_v0 = vpop.xlane.xlu0 %1025 }
 0x19d   : > { %v1034_v1 = vmul.f32 0.0078125, %v1026_v0  ;;  %v1049_v25 = vsub.f32 %v1035_v17, %v1042_v16  ;;  %1970 = vrsqrt.f32 %v1061_v21 }
 0x19f   : > { %v1048_v18 = vsub.f32 %v1034_v1, %v1041_v12  ;;  %v1063_v26 = vadd.f32 1e-06, %v1049_v25 }
 0x1a0   : > { %v1963_v22 = vpop.eup %1962 }
 0x1a1   : > { %v1062_v15 = vadd.f32 1e-06, %v1048_v18  ;;  %v1965_v28 = vpop.eup %1964  ;;  %v1071_v27 = vmul.f32 %v1963_v22, %v1050_v20 }
 0x1a2   : > { %v1072_v9 = vmul.f32 %v1965_v28, %v1051_v5 }
 0x1a3   : > { %1972 = vrsqrt.f32 %v1062_v15 }
 0x1a4   : > { %v1967_v11 = vpop.eup %1966  ;;  %1974 = vrsqrt.f32 %v1063_v26  ;;  %v1056_v26 = vsub.f32 %v2577_v50, %v2642_v6 }
 0x1a5   : > { %v1969_v37 = vpop.eup %1968  ;;  %v1073_v63 = vmul.f32 %v1967_v11, %v1052_v31 }
 0x1a6   : > { %v1074_v1 = vmul.f32 %v1969_v37, %v1053_v51 }
 0x1aa   : > { %v1971_v20 = vpop.eup %1970 }
 0x1ab   : > { %v1075_v28 = vmul.f32 %v1971_v20, %v1054_v30 }
 0x233   : > { %v886_v53 = vpop.f32.mrf.mxu0 }
 0x234   : > { %v887_v45 = vadd.f32 %v886_v53, %v2663_v32 }
 0x235   : > { %v888_v19 = vpop.f32.mrf.mxu0 }
 0x236   : > { %v889_v10 = vadd.f32 %v888_v19, %v2652_v14 }
 0x237   : > { %v890_v23 = vpop.f32.mrf.mxu0 }
 0x238   : > { %v1078_v24 = vadd.f32 1.0, %v889_v10  ;;  %v891_v46 = vadd.f32 %v890_v23, %v2663_v32  ;;  %v1055_v10 = vsub.f32 %v2570_v48, %v2635_v36  ;;  %v1973_v23 = vpop.eup %1972 }
 0x239   : > { %v892_v29 = vpop.f32.mrf.mxu0  ;;  %v1975_v36 = vpop.eup %1974 }
 0x23a   : > { %v893_v33 = vadd.f32 %v892_v29, %v2652_v14  ;;  %v2666_v8 = vpop.f32.mrf.mxu1  ;;  %v1085_v35 = vmul.f32 %v1078_v24, %v1071_v27  ;;  %v1077_v51 = vmul.f32 %v1975_v36, %v1056_v26 }
 0x23b   : > { %v896_v34 = vpop.f32.mrf.mxu0 }
 0x23c   : > { %v1079_v38 = vadd.f32 1.0, %v893_v33  ;;  %v2670_v44 = vpop.f32.mrf.mxu1  ;;  %v1092_v55 = vadd.f32 %v1085_v35, %v887_v45  ;;  %v897_v17 = vadd.f32 %v896_v34, %v2663_v32  ;;  %v1076_v35 = vmul.f32 %v1973_v23, %v1055_v10 }
 0x23d   : > { %v898_v43 = vpop.f32.mrf.mxu0 }
 0x23e   : > { %v1086_v49 = vmul.f32 %v1079_v38, %v1072_v9  ;;  %v899_v52 = vadd.f32 %v898_v43, %v2652_v14  ;;  %v2677_v0 = vpop.f32.mrf.mxu1 }
 0x23f   : > { %v900_v54 = vpop.f32.mrf.mxu0 }
 0x240   : > { %v1093_v57 = vadd.f32 %v1086_v49, %v891_v46  ;;  %v1080_v58 = vadd.f32 1.0, %v899_v52  ;;  %v2682_v61 = vpop.f32.mrf.mxu1  ;;  %v901_v53 = vadd.f32 %v900_v54, %v2663_v32 }
 0x241   : > { %v902_v60 = vpop.f32.mrf.mxu0 }
 0x242   : > { %v903_v2 = vadd.f32 %v902_v60, %v2652_v14  ;;  %v1099_v3 = vpack.c.bf16 %v1093_v57, %v1092_v55  ;;  %v1087_v12 = vmul.f32 %v1080_v58, %v1073_v63  ;;  %v1912_v63 = vld [vmem:[#allocation10 + $0x38] sm:$0xff]  }
 0x243   : > { %v906_v7 = vpop.f32.mrf.mxu0  ;;  %1763 = vmatprep.subr.bf16.mxu1 %v1912_v63 }
 0x244   : > { %v1081_v62 = vadd.f32 1.0, %v903_v2  ;;  %1755 = vmatprep.mubr.bf16.mxu0 %v1099_v3  ;;  %v1094_v22 = vadd.f32 %v1087_v12, %v897_v17  ;;  %v907_v31 = vadd.f32 %v906_v7, %v2663_v32  ;;  %1764 = vmatpush3.bf16.msra.mxu1 %v1912_v63  ;;  %v1913_v2 = vld [vmem:[#allocation10 + $0x30] sm:$0xff]   ;;  %v1915_v3 = vld [vmem:[#allocation10 + $0x20] sm:$0xff]   ;;  %v1916_v7 = vld [vmem:[#allocation10 + $0x18] sm:$0xff]  }
 0x245   : > { %v908_v16 = vpop.f32.mrf.mxu0  ;;  %1765 = vmatprep.subr.bf16.mxu1 %v1913_v2  ;;  %v1918_v12 = vld [vmem:[#allocation10 + $0x8] sm:$0xff]  }
 0x246   : > { %v1088_v18 = vmul.f32 %v1081_v62, %v1074_v1  ;;  %v909_v19 = vadd.f32 %v908_v16, %v2652_v14  ;;  %v2687_v4 = vpop.f32.mrf.mxu1  ;;  %v1919_v1 = vld [vmem:[#allocation10] sm:$0xff]  }
 0x247   : > { %v910_v21 = vpop.f32.mrf.mxu0  ;;  %v1644_v62 = vld [vmem:[%s2799_s7] ss:$0 sm:$0xff] }
 0x248   : > { %v1095_v25 = vadd.f32 %v1088_v18, %v901_v53  ;;  %v1082_v56 = vadd.f32 1.0, %v909_v19  ;;  %v2691_v15 = vpop.f32.mrf.mxu1  ;;  %v911_v43 = vadd.f32 %v910_v21, %v2663_v32  ;;  %1766 = vmatpush3.bf16.msra.mxu1 %v1913_v2 }
 0x249   : > { %v912_v5 = vpop.f32.mrf.mxu0 }
 0x24a   : > { %v1100_v24 = vpack.c.bf16 %v1095_v25, %v1094_v22  ;;  %v913_v29 = vadd.f32 %v912_v5, %v2652_v14  ;;  %v1738_v33 = vpop.f32.mrf.mxu1  ;;  %v1089_v34 = vmul.f32 %v1082_v56, %v1075_v28 }
 0x24b   : > { %v916_v27 = vpop.f32.mrf.mxu0 }
 0x24c   : > { %v1083_v9 = vadd.f32 1.0, %v913_v29  ;;  %1756 = vmatmul.mubr.bf16.vlgmr.msra.gmra.mxu0 %v1100_v24  ;;  %v1096_v52 = vadd.f32 %v1089_v34, %v907_v31  ;;  %v917_v6 = vadd.f32 %v916_v27, %v2663_v32  ;;  %v1917_v32 = vld [vmem:[#allocation10 + $0x10] sm:$0xff]  }
 0x24d   : > { %v918_v38 = vpop.f32.mrf.mxu0 }
 0x24e   : > { %v1090_v45 = vmul.f32 %v1083_v9, %v1076_v35  ;;  %v919_v46 = vadd.f32 %v918_v38, %v2652_v14  ;;  %v1914_v14 = vld [vmem:[#allocation10 + $0x28] sm:$0xff]  }
 0x24f   : > { %v920_v49 = vpop.f32.mrf.mxu0  ;;  %1767 = vmatprep.subr.bf16.mxu1 %v1914_v14 }
 0x250   : > { %v1097_v11 = vadd.f32 %v1090_v45, %v911_v43  ;;  %v1084_v54 = vadd.f32 1.0, %v919_v46  ;;  %1768 = vmatpush3.bf16.msra.mxu1 %v1914_v14 }
 0x251   : > { %v921_v55 = vpop.f32.mrf.mxu0  ;;  %1769 = vmatprep.subr.bf16.mxu1 %v1915_v3 }
 0x252   : > { %v1091_v57 = vmul.f32 %v1084_v54, %v1077_v51  ;;  %v1101_v58 = vpack.c.bf16 %v1097_v11, %v1096_v52 }
 0x254   : > { %1759 = vmatprep.mubr.bf16.mxu0 %v1101_v58  ;;  %v1098_v37 = vadd.f32 %v1091_v57, %v917_v6  ;;  %1770 = vmatpush3.bf16.msra.mxu1 %v1915_v3 }
 0x255   : > { %1771 = vmatprep.subr.bf16.mxu1 %v1916_v7 }
 0x256   : > { %v1102_v60 = vpack.c.bf16 %v1098_v37, %v1098_v37 }
 0x258   : > { %1760 = vmatmul.mubr.bf16.gmra.mxu0 %v1102_v60  ;;  %1772 = vmatpush3.bf16.msra.mxu1 %v1916_v7 }
 0x259   : > { %1773 = vmatprep.subr.bf16.mxu1 %v1917_v32 }
 0x25c   : > { %1774 = vmatpush3.bf16.msra.mxu1 %v1917_v32 }
 0x25d   : > { %1775 = vmatprep.subr.bf16.mxu1 %v1918_v12 }
 0x260   : > { %1776 = vmatpush3.bf16.msra.mxu1 %v1918_v12 }
 0x261   : > { %1777 = vmatprep.subr.bf16.mxu1 %v1919_v1 }
 0x264   : > { %1778 = vmatpush3.bf16.msra.mxu1 %v1919_v1 }
 0x30c   : > { %v1757_v30 = vpop.f32.mrf.mxu0 }
 0x30d   : > { %v1217_v16 = vadd.f32 %v1757_v30, %v1644_v62 }
 0x30e   : > { %v1208_v17 = vpop.f32.mrf.mxu0 }
 0x30f   : > { %v1655_v53 = vmul.f32 -1.442695, %v1217_v16  ;;  %v1209_v18 = vadd.f32 %v1644_v62, %v1208_v17 }
 0x310   : > { %v1758_v19 = vpop.f32.mrf.mxu0 }
 0x311   : > { %v1653_v20 = vmul.f32 -1.442695, %v1209_v18  ;;  %v1220_v21 = vadd.f32 %v1758_v19, %v1644_v62  ;;  %1976 = vpow2.f32 %v1655_v53 }
 0x312   : > { %v1211_v10 = vpop.f32.mrf.mxu0 }
 0x313   : > { %1978 = vpow2.f32 %v1653_v20  ;;  %v1656_v22 = vmul.f32 -1.442695, %v1220_v21  ;;  %v1212_v25 = vadd.f32 %v1644_v62, %v1211_v10  ;;  %v976_v10 = vpop.f32.mrf.mxu1 }
 0x315   : > { %1980 = vpow2.f32 %v1656_v22  ;;  %v1654_v56 = vmul.f32 -1.442695, %v1212_v25 }
 0x317   : > { %1982 = vpow2.f32 %v1654_v56 }
 0x318   : > { %v1761_v23 = vpop.f32.mrf.mxu0 }
 0x319   : > { %v1233_v5 = vadd.f32 %v1761_v23, %v1644_v62 }
 0x31a   : > { %v1224_v24 = vpop.f32.mrf.mxu0 }
 0x31b   : > { %v1659_v28 = vmul.f32 -1.442695, %v1233_v5  ;;  %v1225_v29 = vadd.f32 %v1644_v62, %v1224_v24 }
 0x31c   : > { %v1762_v27 = vpop.f32.mrf.mxu0 }
 0x31d   : > { %1984 = vpow2.f32 %v1659_v28  ;;  %v1657_v33 = vmul.f32 -1.442695, %v1225_v29 }
 0x31e   : > { %v1227_v26 = vpop.f32.mrf.mxu0  ;;  %v1977_v34 = vpop.eup %1976 }
 0x31f   : > { %1986 = vpow2.f32 %v1657_v33  ;;  %v1228_v35 = vadd.f32 %v1644_v62, %v1227_v26  ;;  %v1261_v43 = vadd.f32 1.0, %v1977_v34 }
 0x320   : > { %v1979_v9 = vpop.eup %1978 }
 0x321   : > { %v1259_v36 = vadd.f32 1.0, %v1979_v9  ;;  %v1658_v38 = vmul.f32 -1.442695, %v1228_v35 }
 0x322   : > { %v1981_v31 = vpop.eup %1980 }
 0x323   : > { %1988 = vrcp.f32 %v1259_v36  ;;  %v1262_v45 = vadd.f32 1.0, %v1981_v31 }
 0x324   : > { %v1983_v46 = vpop.eup %1982  ;;  %1990 = vpow2.f32 %v1658_v38 }
 0x325   : > { %1992 = vrcp.f32 %v1262_v45  ;;  %v1260_v49 = vadd.f32 1.0, %v1983_v46 }
 0x326   : > { %1994 = vrcp.f32 %v1261_v43 }
 0x327   : > { %1996 = vrcp.f32 %v1260_v49 }
 0x32a   : > { %v1985_v52 = vpop.eup %1984 }
 0x32b   : > { %v1265_v51 = vadd.f32 1.0, %v1985_v52 }
 0x32c   : > { %v1987_v11 = vpop.eup %1986 }
 0x32d   : > { %v1263_v54 = vadd.f32 1.0, %v1987_v11  ;;  %1998 = vrcp.f32 %v1265_v51 }
 0x32f   : > { %2000 = vrcp.f32 %v1263_v54 }
 0x330   : > { %v1989_v55 = vpop.eup %1988 }
 0x331   : > { %v1991_v6 = vpop.eup %1990  ;;  %v1280_v2 = vmul.f32 %v1989_v55, %v1209_v18 }
 0x332   : > { %v1993_v57 = vpop.eup %1992  ;;  %v1264_v58 = vadd.f32 1.0, %v1991_v6 }
 0x333   : > { %v1995_v37 = vpop.eup %1994  ;;  %v1283_v63 = vmul.f32 %v1993_v57, %v1220_v21  ;;  %v719_v21 = vsub.s32 2, %v2637_v59 }
 0x334   : > { %v1997_v60 = vpop.eup %1996  ;;  %2002 = vrcp.f32 %v1264_v58  ;;  %v1282_v3 = vmul.f32 %v1995_v37, %v1217_v16  ;;  %v1660_v16 = vld [vmem:[%s2801_s9] ss:$0 sm:$0xff] }
 0x335   : > { %v1281_v14 = vmul.f32 %v1997_v60, %v1212_v25  ;;  %v720_v18 = vrot.slane %v2649_v13, %v719_v21 }
 0x336   : > { %v1288_v32 = vpack.c.bf16 %v1283_v63, %v1282_v3 }
 0x337   : > { %v1287_v7 = vpack.c.bf16 %v1281_v14, %v1280_v2  ;;  %v966_v25 = vadd.f32 %v2666_v8, %v720_v18  ;;  %v969_v59 = vadd.f32 %v2677_v0, %v720_v18  ;;  %v961_v34 = vadd.f32 %v2682_v61, %v720_v18 }
 0x338   : > { %v982_v36 = vadd.f32 %v2687_v4, %v720_v18  ;;  %v977_v11 = vadd.f32 %v976_v10, %v720_v18 }
 0x339   : > { %1779 = vmatprep.mubr.bf16.mxu1 %v1287_v7 }
 0x33a   : > { %1780 = vmatmul.mubr.bf16.vlgmr.msra.gmra.mxu1 %v1288_v32  ;;  %v1999_v12 = vpop.eup %1998 }
 0x33b   : > { %v1286_v30 = vmul.f32 %v1999_v12, %v1233_v5  ;;  %v958_v5 = vadd.f32 %v2670_v44, %v720_v18 }
 0x33c   : > { %v2001_v1 = vpop.eup %2000 }
 0x33d   : > { %v1284_v17 = vmul.f32 %v2001_v1, %v1225_v29  ;;  %v1290_v20 = vpack.c.bf16 %v1286_v30, %v1286_v30 }
 0x341   : > { %v2003_v62 = vpop.eup %2002 }
 0x342   : > { %v1285_v53 = vmul.f32 %v2003_v62, %v1228_v35 }
 0x344   : > { %v1289_v19 = vpack.c.bf16 %v1285_v53, %v1284_v17 }
 0x346   : > { %1783 = vmatprep.mubr.bf16.mxu1 %v1289_v19 }
 0x347   : > { %1784 = vmatmul.mubr.bf16.gmra.mxu1 %v1290_v20 }
 0x3fa   : > { %v1781_v22 = vpop.f32.mrf.mxu1 }
 0x3fb   : > { %v1405_v56 = vadd.f32 %v1781_v22, %v1660_v16 }
 0x3fc   : > { %v1396_v23 = vpop.f32.mrf.mxu1 }
 0x3fd   : > { %v1428_v24 = vmul.f32 %v1405_v56, %v966_v25  ;;  %v1397_v28 = vadd.f32 %v1660_v16, %v1396_v23 }
 0x3fe   : > { %v1782_v29 = vpop.f32.mrf.mxu1 }
 0x3ff   : > { %v1435_v13 = vadd.f32 %v1428_v24, %v2551_v41  ;;  %v1426_v27 = vmul.f32 %v1397_v28, %v958_v5  ;;  %v1408_v33 = vadd.f32 %v1782_v29, %v1660_v16 }
 0x400   : > { %v1399_v26 = vpop.f32.mrf.mxu1 }
 0x401   : > { %1442 = vst [vmem:[%s2714_s20 + $0x10] sm:$0xff] %v1435_v13  ;;  %v1433_v8 = vadd.f32 %v1426_v27, %v2543_v39  ;;  %v1429_v44 = vmul.f32 %v1408_v33, %v969_v59  ;;  %v1400_v35 = vadd.f32 %v1660_v16, %v1399_v26  ;;  %v974_v39 = vadd.f32 %v2691_v15, %v720_v18 }
 0x403   : > { %1440 = vst [vmem:[%s2714_s20] sm:$0xff] %v1433_v8  ;;  %v1436_v0 = vadd.f32 %v1429_v44, %v2554_v42  ;;  %v1427_v41 = vmul.f32 %v1400_v35, %v961_v34 }
 0x405   : > { %1443 = vst [vmem:[%s2714_s20 + $0x18] sm:$0xff] %v1436_v0  ;;  %v1434_v9 = vadd.f32 %v1427_v41, %v2547_v40 }
 0x407   : > { %1441 = vst [vmem:[%s2714_s20 + $0x8] sm:$0xff] %v1434_v9  ;;  %v1785_v61 = vpop.f32.mrf.mxu1 }
 0x408   : > { %v1421_v38 = vadd.f32 %v1785_v61, %v1660_v16 }
 0x409   : > { %v1412_v31 = vpop.f32.mrf.mxu1 }
 0x40a   : > { %v1432_v43 = vmul.f32 %v1421_v38, %v982_v36  ;;  %v1413_v45 = vadd.f32 %v1660_v16, %v1412_v31 }
 0x40b   : > { %v1786_v46 = vpop.f32.mrf.mxu1 }
 0x40c   : > { %v1439_v42 = vadd.f32 %v1432_v43, %v2577_v50  ;;  %v1430_v49 = vmul.f32 %v1413_v45, %v974_v39 }
 0x40d   : > { %v1415_v52 = vpop.f32.mrf.mxu1 }
 0x40e   : > { %1446 = vst [vmem:[%s2714_s20 + $0x30] sm:$0xff] %v1439_v42  ;;  %v1437_v40 = vadd.f32 %v1430_v49, %v2567_v47  ;;  %v1416_v51 = vadd.f32 %v1660_v16, %v1415_v52 }
 0x410   : > { %1444 = vst [vmem:[%s2714_s20 + $0x20] sm:$0xff] %v1437_v40  ;;  %v1431_v4 = vmul.f32 %v1416_v51, %v977_v11  ;;  %1454 = sbr.rel (!%p2828_p10) target bundleno = 1072 (0x430), region = 84 }
 0x412   : > { %v1438_v54 = vadd.f32 %v1431_v4, %v2570_v48 }
 0x414   : > { %1445 = vst [vmem:[%s2714_s20 + $0x28] sm:$0xff] %v1438_v54 }
 0x415   : > { %s2842_s0 = smov (!%p1457_p1, %s1456_s0), 7 }
 0x416   : > { %s2735_s27 = sshll.u32 %s2842_s0, 7 }
 0x417   : > { %s1461_s19 = ssub.s32 896, %s2735_s27 }
 0x418   : > { %1462 = vsyncadd %s1448_s29, %s1461_s19  ;;  %p1670_p0 = scmp.ne.s32.totalorder %s2735_s27, 0  ;;  %s1678_s25 = smul.u32 896, %s2305_s17 }
 0x419   : > { %s1467_s24 = sshll.u32 %s2714_s20, 4  ;;  %s2226_s30 = smov [#allocation11]   ;;  %s2748_s24 = int_to_ptr.vmem [resolvable:$true] %s1467_s24 }
 0x41a   : > { %s2746_s13 = scalar_lea.hbm %s2802_s10, %s1678_s25  ;;  %s2134_s12 = scalar_lea.vmem %s2748_s24, %s2735_s27 }
 0x41b   : > { %p2135_p2 = scmp.ne.s32.totalorder %s2748_s24, %s2134_s12  ;;  %s2138_s23 = sshll.u32 %s2226_s30, 4  ;;  %s2139_s23 = int_to_ptr.vmem [resolvable:$false] %s2138_s23 }
 0x41c   : > { %s2140_s17 = scalar_lea.vmem %s2139_s23, 1792  ;;  %p2141_p6 = scmp.lt.s32.totalorder %s2748_s24, %s2139_s23 }
 0x41d   : > { %p2136_p3 = pnand %p2135_p2, %p1670_p0  ;;  %p2142_p11 = scmp.lt.s32.totalorder %s2140_s17, %s2134_s12 }
 0x41f   : > { %p2137_p12 = pneg %p2136_p3  ;;  %p2143_p4 = por %p2142_p11, %p2141_p6 }
 0x421   : > { %p2144_p7 = pnand %p2143_p4, %p2137_p12 }
 0x423   : > { %2147 = shalt.err (!%p2144_p7)
}
 0x424   : > { %s2148_s28 = scalar_lea.hbm %s2746_s13, %s2735_s27  ;;  %s2152_s20 = scalar_lea.hbm %s2802_s10, 4096 }
 0x425   : > { %p2149_p13 = scmp.ne.s32.totalorder %s2746_s13, %s2148_s28  ;;  %p2153_p8 = scmp.lt.s32.totalorder %s2746_s13, %s2802_s10 }
 0x426   : > { %p2154_p10 = scmp.lt.s32.totalorder %s2152_s20, %s2148_s28 }
 0x427   : > { %p2150_p5 = pnand %p2149_p13, %p1670_p0 }
 0x428   : > { %p2155_p1 = por %p2154_p10, %p2153_p8 }
 0x429   : > { %p2151_p9 = pneg %p2150_p5 }
 0x42b   : > { %p2156_p2 = pnand %p2155_p1, %p2151_p9 }
 0x42d   : > { %2159 = shalt.err (!%p2156_p2)
}
 0x42e   : > { %s2227_s19 = smov 128   ;;  %s2228_s25 = smov 8  }
 0x42f   : > { %1473 = dma.vmem_to_hbm [thread:$0]  (%p1670_p0), %s2748_s24, %s2735_s27, %s2746_s13, %s1448_s29, %s2227_s19, %s2227_s19, %s2228_s25  }
 0x430 PF: > { %s2829_s11 = sld [smem:[#allocation17_spill]]  ;;  %p1825_p3 = scmp.ge.s32.totalorder %s2210_s16, 2 }
 0x431   : > { %s2830_s4 = sld [smem:[#allocation20_spill]] }
 0x436   : > { %s1482_s12 = sand.u32 1, %s2829_s11  }
 0x437   : > { %p2831_p12 = scmp.ne.s32.totalorder %s2830_s4, 0  ;;  %s1483_s30 = scalar_lea.sflag [#allocation4], %s1482_s12 }
 0x439   : > { %p1816_p6 = pnand %p1825_p3, %p2831_p12 }
 0x43b   : > { %p1817_p11 = pneg %p1816_p6 }
 0x43d   : > { %2193 = dma.done.wait (%p1817_p11), %s1483_s30, 896  }
 0x43e   : > { %2195 = vsyncadd (%p1817_p11), %s1483_s30, 4294966400  ;;  %s2832_s16 = sld [smem:[#allocation18_spill]]  ;;  %s2834_s13 = smov %s2202_s14 }
 0x43f   : > { %s2833_s23 = sld [smem:[#allocation19_spill]]  ;;  %s2835_s14 = smov %s2206_s15 }
 0x444   : > { %p27_p4 = scmp.ge.s32.totalorder %s2832_s16, 7  }
 0x445   : > { %s2836_s15 = smov %s2833_s23 }
 0x446   :  { %29 = sbr.rel (!%p27_p4) target bundleno = 11 (0xb), region = 130 }
 0x44b   :  { %1488 = vsyncpa [#allocation3], 1 }
 0x44c   :  { %1490 = vsyncpa [#allocation3 + $0x1], 1 }
 0x44d   :  { %1491 = vsyncpa [#allocation6], 1 }
 0x44e   :  { %1493 = vsyncpa [#allocation6 + $0x1], 1 }
 0x44f   :  { %1494 = vsyncpa [#allocation9], 1 }
 0x450   :  { %1495 = vsyncpa [#allocation4], 1 }
 0x451   :  { %1497 = vsyncpa [#allocation4 + $0x1], 1 }

</bundles_post_ra>
